<compile_context>
chip_gen: v6e
topology: v6e:2x2x1
jax: 0.10.0
libtpu: 0.0.40
codegen_flags: <defaults>
</compile_context>

<pallas_src>
import math

import jax
import jax.numpy as jnp
from jax import lax
from jax.experimental import pallas as pl
from jax.experimental.pallas import tpu as pltpu

# ----------------------------- model config ---------------------------------
NUM_EXPERTS = 4
TOP_K = 2
HIDDEN = 128
TEXT_DIM = 64
IMAGE_DIM = 96
LN_EPS = 1e-5

BATCH = 2
SEQ = 8

MIN_TOKEN_TILE = 128
MAX_TOKEN_TILE = 2048            # big tiles amortize the ~0.35us/step grid overhead
VMEM_LIMIT_BYTES = 48 * 1024 * 1024   # > v5e 16MiB default, < v7x 64MiB physical

# bf16 elementwise on the heavy (2T, E*H) slab: ~2x VPU/EUP throughput on
# v6e/v7x and halves the largest VMEM intermediate.  Set to jnp.float32 on
# v5e (no bf16 VALU/EUP there).
HEAVY_ELEMENTWISE_DTYPE = jnp.bfloat16

_SQRT_2_OVER_PI = math.sqrt(2.0 / math.pi)


# ----------------------------- shared math -----------------------------------
def _gelu_tanh(x):
    # tanh-approx GELU (EUP-friendly); used everywhere in the kernel.
    return 0.5 * x * (1.0 + jnp.tanh(_SQRT_2_OVER_PI * (x + 0.044715 * x * x * x)))


def _layernorm(x, gamma, beta):
    mu = jnp.mean(x, axis=-1, keepdims=True)
    var = jnp.mean((x - mu) ** 2, axis=-1, keepdims=True)
    return (x - mu) * lax.rsqrt(var + LN_EPS) * gamma + beta


def _fused_moe(z, gw, gb, w1_big, b1_wide, w2_big, b2_mat):
    """MoE on the fused (2T, H) slab (l2 + cl branches stacked on sublanes).

    Gating (softmax + first-occurrence top-k) runs in f32 for selection
    stability.  Experts run as two wide bf16 matmuls with f32 accumulation;
    the top-k gate weights scale the four 128-lane column blocks of h1 so the
    weighted combine IS the second matmul.
    """
    f32 = jnp.float32

    # ---- gating (f32) ----
    gate = jnp.dot(z, gw, preferred_element_type=f32) + gb            # (2T, E)
    gmax = jnp.max(gate, axis=-1, keepdims=True)
    ge = jnp.exp(gate - gmax)
    probs = ge / jnp.sum(ge, axis=-1, keepdims=True)                  # (2T, E)

    ids = lax.broadcasted_iota(jnp.int32, probs.shape, 1)             # (2T, E)
    remaining = probs
    sel_w = jnp.zeros_like(probs)
    for _ in range(TOP_K):
        cur_max = jnp.max(remaining, axis=-1, keepdims=True)
        # first occurrence of the max (matches torch.topk tie behavior)
        amax = jnp.min(jnp.where(remaining == cur_max, ids, NUM_EXPERTS),
                       axis=-1, keepdims=True)
        first = ids == amax
        sel_w = jnp.where(first, probs, sel_w)
        remaining = jnp.where(first, jnp.float32(-1e30), remaining)

    # ---- experts, fully batched (bf16 MXU operands, f32 accumulate) ----
    cdt = HEAVY_ELEMENTWISE_DTYPE
    h1 = (jnp.dot(z.astype(jnp.bfloat16), w1_big,
                  preferred_element_type=f32) + b1_wide).astype(cdt)  # (2T, E*H)
    h1 = _gelu_tanh(h1)
    # fold the top-k gate weights into h1 per 128-lane expert block
    # (no f32 expand matmul, no (2T, E*H) f32 intermediate)
    blocks = [h1[:, e * HIDDEN:(e + 1) * HIDDEN] * sel_w[:, e:e + 1].astype(cdt)
              for e in range(NUM_EXPERTS)]
    h1s = jnp.concatenate(blocks, axis=-1).astype(jnp.bfloat16)       # (2T, E*H)
    # second layer + weighted combine in ONE matmul; weighted bias via sel_w @ b2
    return (jnp.dot(h1s, w2_big, preferred_element_type=f32)
            + jnp.dot(sel_w, b2_mat, preferred_element_type=f32))     # (2T, H)


def _post_and_heads(moe, l2_resid, cl_resid,
                    l2g, l2b, clg, clb, ol2w, ol2b, oclw, oclb):
    """LayerNorm stats once over the (2T, H) slab, then per-branch gamma/beta +
    GELU + residual, then the two output heads (bf16 operands, f32 accum)."""
    f32 = jnp.float32
    t = l2_resid.shape[0]
    mu = jnp.mean(moe, axis=-1, keepdims=True)
    var = jnp.mean((moe - mu) ** 2, axis=-1, keepdims=True)
    xn = (moe - mu) * lax.rsqrt(var + LN_EPS)                         # (2T, H)
    l2_o = _gelu_tanh(xn[:t] * l2g + l2b) + l2_resid
    cl_o = _gelu_tanh(xn[t:] * clg + clb) + cl_resid
    l2_res = jnp.dot(l2_o.astype(jnp.bfloat16), ol2w, preferred_element_type=f32) + ol2b
    cl_res = jnp.dot(cl_o.astype(jnp.bfloat16), oclw, preferred_element_type=f32) + oclb
    return l2_res, cl_res


# ------------------------------- kernel -------------------------------------
def moe_predictor_kernel(
    x_ref,                              # (T, D_in_pad)          f32
    ew_ref, eb_ref,                     # (D_in_pad, H), (1, H)  f32
    l2e_ref, cle_ref,                   # (1, H) each            f32
    gw_ref, gb_ref,                     # (H, E), (1, E)         f32
    w1_ref, b1_ref,                     # (H, E*H) bf16, (1, E*H) f32
    w2_ref, b2_ref,                     # (E*H, H) bf16, (E, H)  f32
    l2g_ref, l2b_ref, clg_ref, clb_ref, # (1, H) each            f32
    ol2w_ref, ol2b_ref,                 # (H, 128) bf16, (1, 128) f32 (lane-padded)
    oclw_ref, oclb_ref,                 # (H, H) bf16, (1, H)    f32
    l2_out_ref,                         # (T, 128)               f32
    cl_out_ref,                         # (T, H)                 f32
    z_scratch,                          # (2T, H)                f32 VMEM scratch
):
    t = x_ref.shape[0]

    # embed + GELU (f32: feeds the gating path), then the two task embeddings;
    # fuse the l2 / cl branches along the token (sublane) axis -> one MoE pass.
    h = _gelu_tanh(jnp.dot(x_ref[...], ew_ref[...],
                           preferred_element_type=jnp.float32) + eb_ref[...])
    z_scratch[pl.ds(0, t), :] = h + l2e_ref[...]
    z_scratch[pl.ds(t, t), :] = h + cle_ref[...]

    moe = _fused_moe(z_scratch[...], gw_ref[...], gb_ref[...],
                     w1_ref[...], b1_ref[...], w2_ref[...], b2_ref[...])

    l2_res, cl_res = _post_and_heads(
        moe,
        z_scratch[pl.ds(0, t), :], z_scratch[pl.ds(t, t), :],   # residuals from scratch
        l2g_ref[...], l2b_ref[...], clg_ref[...], clb_ref[...],
        ol2w_ref[...], ol2b_ref[...], oclw_ref[...], oclb_ref[...])

    l2_out_ref[...] = l2_res.astype(l2_out_ref.dtype)
    cl_out_ref[...] = cl_res.astype(cl_out_ref.dtype)


# --------------------------- param preparation -------------------------------
def prep_params(params):
    """Layout plumbing (done once outside the kernel): batch the expert weights
    into wide matmul operands, cast heavy matmul weights to bf16, lane-pad the
    embed input dim to 128 and the 96-wide l2 head to 128."""
    (ew, eb, l2e, cle, gw, gb, w1, b1, w2, b2,
     l2g, l2b, clg, clb, ol2w, ol2b, oclw, oclb) = params
    E, H = NUM_EXPERTS, HIDDEN

    d_in = ew.shape[0]
    d_in_pad = ((d_in + 127) // 128) * 128
    ew_p = jnp.pad(ew, ((0, d_in_pad - d_in), (0, 0)))                # zero rows: same math

    w1_big = jnp.transpose(w1, (1, 0, 2)).reshape(H, E * H).astype(jnp.bfloat16)
    b1_wide = b1.reshape(1, E * H)
    w2_big = w2.reshape(E * H, H).astype(jnp.bfloat16)
    b2_mat = b2.reshape(E, H)

    d_out = ol2w.shape[1]
    d_pad = ((d_out + 127) // 128) * 128
    ol2w_p = jnp.pad(ol2w, ((0, 0), (0, d_pad - d_out))).astype(jnp.bfloat16)
    ol2b_p = jnp.pad(ol2b, ((0, 0), (0, d_pad - d_out)))
    oclw_b = oclw.astype(jnp.bfloat16)

    prepped = (ew_p, eb, l2e, cle, gw, gb,
               w1_big, b1_wide, w2_big, b2_mat,
               l2g, l2b, clg, clb, ol2w_p, ol2b_p, oclw_b, oclb)
    return prepped, d_in, d_in_pad, d_out, d_pad


def _pick_token_tile(n):
    """Small N: one tile (grid=1).  Large N: guarantee grid >= 2 (v7x megacore)
    and cap the tile at MAX_TOKEN_TILE; tile is a multiple-of-8 divisor of N."""
    if n <= 2 * MIN_TOKEN_TILE:
        return n
    cap = min(MAX_TOKEN_TILE, n // 2)
    start = cap - (cap % 8)
    for t in range(start, MIN_TOKEN_TILE - 1, -8):
        if n % t == 0:
            return t
    return n


# ------------------------------ wrapper --------------------------------------
def moe_predictor_forward(x, params, token_tile=None):
    """x: (B, S, D_in) f32.  Returns (l2_result (B,S,IMAGE_DIM), cl_result (B,S,HIDDEN))."""
    B, S, D_in = x.shape
    N = B * S
    prepped, _, d_in_pad, d_out, d_pad = prep_params(params)

    if token_tile is None:
        token_tile = _pick_token_tile(N)
    assert N % token_tile == 0
    grid_steps = N // token_tile

    x2 = x.reshape(N, D_in)
    if d_in_pad != D_in:
        x2 = jnp.pad(x2, ((0, 0), (0, d_in_pad - D_in)))              # lane-dense input

    def const_spec(arr):
        nd = arr.ndim
        idx = lambda i, _nd=nd: (0,) * _nd
        if grid_steps > 1:
            # invariant weights/biases: single-buffer (double-buffering is waste)
            return pl.BlockSpec(arr.shape, idx, pipeline_mode=pl.Buffered(1))
        return pl.BlockSpec(arr.shape, idx)

    in_specs = [pl.BlockSpec((token_tile, d_in_pad), lambda i: (i, 0))]
    in_specs += [const_spec(p) for p in prepped]
    out_specs = [
        pl.BlockSpec((token_tile, d_pad), lambda i: (i, 0)),          # lane-dense (padded)
        pl.BlockSpec((token_tile, HIDDEN), lambda i: (i, 0)),
    ]
    # NOTE: outputs stay f32; on v5e (lowest HBM BW) bf16 outputs would halve
    # activation write traffic if the consumer tolerates it.
    out_shape = [
        jax.ShapeDtypeStruct((N, d_pad), jnp.float32),
        jax.ShapeDtypeStruct((N, HIDDEN), jnp.float32),
    ]

    l2_flat, cl_flat = pl.pallas_call(
        moe_predictor_kernel,
        out_shape=out_shape,
        grid_spec=pltpu.PrefetchScalarGridSpec(
            num_scalar_prefetch=0,
            grid=(grid_steps,),
            in_specs=in_specs,
            out_specs=out_specs,
            scratch_shapes=[pltpu.VMEM((2 * token_tile, HIDDEN), jnp.float32)],
        ),
        compiler_params=pltpu.CompilerParams(
            dimension_semantics=("parallel",),
            vmem_limit_bytes=VMEM_LIMIT_BYTES,
        ),
    )(x2, *prepped)

    return (l2_flat[:, :d_out].reshape(B, S, d_out),
            cl_flat.reshape(B, S, HIDDEN))


# --------------------------- parameter init ----------------------------------
def init_params(key):
    """Deterministic Kaiming-uniform-style init (weights stored as (in, out))."""
    keys = iter(jax.random.split(key, 32))

    def kaiming(shape_in_out):
        fan_in = shape_in_out[0]
        bound = math.sqrt(6.0 / fan_in)
        return jax.random.uniform(next(keys), shape_in_out, jnp.float32, -bound, bound)

    ew = kaiming((TEXT_DIM, HIDDEN))                     # text_embed
    eb = jnp.zeros((1, HIDDEN), jnp.float32)
    l2e = kaiming((1, HIDDEN))                           # l2_task_embedding
    cle = kaiming((1, HIDDEN))                           # cl_task_embedding
    gw = kaiming((HIDDEN, NUM_EXPERTS))                  # gate
    gb = jnp.zeros((1, NUM_EXPERTS), jnp.float32)
    w1 = jnp.stack([kaiming((HIDDEN, HIDDEN)) for _ in range(NUM_EXPERTS)])
    b1 = jnp.zeros((NUM_EXPERTS, 1, HIDDEN), jnp.float32)
    w2 = jnp.stack([kaiming((HIDDEN, HIDDEN)) for _ in range(NUM_EXPERTS)])
    b2 = jnp.zeros((NUM_EXPERTS, 1, HIDDEN), jnp.float32)
    l2g = jnp.ones((1, HIDDEN), jnp.float32)             # LayerNorm defaults
    l2b = jnp.zeros((1, HIDDEN), jnp.float32)
    clg = jnp.ones((1, HIDDEN), jnp.float32)
    clb = jnp.zeros((1, HIDDEN), jnp.float32)
    ol2w = kaiming((HIDDEN, IMAGE_DIM))                  # text_to_image
    ol2b = jnp.zeros((1, IMAGE_DIM), jnp.float32)
    oclw = kaiming((HIDDEN, HIDDEN))                     # cl_text_to_image
    oclb = jnp.zeros((1, HIDDEN), jnp.float32)

    return (ew, eb, l2e, cle, gw, gb, w1, b1, w2, b2,
            l2g, l2b, clg, clb, ol2w, ol2b, oclw, oclb)


# ---------------------- references (for self-check) --------------------------
def reference_forward(x, params):
    """Independent pure-f32 reference: per-expert loop + lax.top_k gather,
    i.e. the module's forward structure (GELU = tanh approximation)."""
    (ew, eb, l2e, cle, gw, gb, w1, b1, w2, b2,
     l2g, l2b, clg, clb, ol2w, ol2b, oclw, oclb) = params

    h = _gelu_tanh(x @ ew + eb)
    l2_in = h + l2e
    cl_in = h + cle

    def moe(z):
        probs = jax.nn.softmax(z @ gw + gb, axis=-1)
        topv, topi = lax.top_k(probs, TOP_K)
        expert_outs = jnp.stack(
            [(_gelu_tanh(z @ w1[e] + b1[e, 0]) @ w2[e] + b2[e, 0])
             for e in range(NUM_EXPERTS)],
            axis=-2)
        sel = jnp.take_along_axis(expert_outs, topi[..., None], axis=-2)
        return jnp.sum(sel * topv[..., None], axis=-2)

    l2_o = _gelu_tanh(_layernorm(moe(l2_in), l2g, l2b)) + l2_in
    cl_o = _gelu_tanh(_layernorm(moe(cl_in), clg, clb)) + cl_in
    return l2_o @ ol2w + ol2b, cl_o @ oclw + oclb


def matched_reference_forward(x2p, prepped):
    """Plain-JAX mirror of the kernel's math (same bf16 casts, same fusion)."""
    (ew, eb, l2e, cle, gw, gb, w1b, b1w, w2b, b2m,
     l2g, l2b, clg, clb, ol2w, ol2b, oclw, oclb) = prepped
    h = _gelu_tanh(jnp.dot(x2p, ew, preferred_element_type=jnp.float32) + eb)
    z = jnp.concatenate([h + l2e, h + cle], axis=0)
    moe = _fused_moe(z, gw, gb, w1b, b1w, w2b, b2m)
    t = x2p.shape[0]
    return _post_and_heads(moe, z[:t], z[t:],
                           l2g, l2b, clg, clb, ol2w, ol2b, oclw, oclb)


# --------------------------------- main ---------------------------------------
if __name__ == "__main__":
    key = jax.random.PRNGKey(0)
    k_param, k_x = jax.random.split(key)
    params = init_params(k_param)
    x = jax.random.normal(k_x, (BATCH, SEQ, TEXT_DIM), jnp.float32)

    l2_out, cl_out = moe_predictor_forward(x, params)
    l2_out = jax.block_until_ready(l2_out)
    cl_out = jax.block_until_ready(cl_out)

    assert l2_out.shape == (BATCH, SEQ, IMAGE_DIM)
    assert cl_out.shape == (BATCH, SEQ, HIDDEN)

    def rel_err(a, b):
        return float(jnp.max(jnp.abs(a - b)) / (jnp.max(jnp.abs(b)) + 1e-6))

    # Tight structural check vs. a plain-JAX mirror with identical (bf16) math.
    prepped, _, d_in_pad, d_out, _ = prep_params(params)
    x2 = x.reshape(-1, TEXT_DIM)
    x2p = jnp.pad(x2, ((0, 0), (0, d_in_pad - TEXT_DIM)))
    l2_m, cl_m = matched_reference_forward(x2p, prepped)
    l2_m = l2_m[:, :d_out].reshape(BATCH, SEQ, d_out)
    cl_m = cl_m.reshape(BATCH, SEQ, HIDDEN)
    assert rel_err(l2_out, l2_m) < 2e-2, ("matched l2", rel_err(l2_out, l2_m))
    assert rel_err(cl_out, cl_m) < 2e-2, ("matched cl", rel_err(cl_out, cl_m))

    # Independent check vs. an f32 per-expert-loop reference (module structure);
    # tolerance bounds the bf16-matmul / bf16-GELU quantization in the kernel
    # (gating path is f32, so expert selection is identical).
    l2_ref, cl_ref = reference_forward(x, params)
    assert rel_err(l2_out, l2_ref) < 5e-2, ("ref l2", rel_err(l2_out, l2_ref))
    assert rel_err(cl_out, cl_ref) < 5e-2, ("ref cl", rel_err(cl_out, cl_ref))

    print("KERNEL_OK")
</pallas_src>

<mosaic_0001>
module attributes {stable_mosaic.version = 11 : i64} {
  func.func @moe_predictor_kernel(%arg0: i32, %arg1: memref<16x128xf32, #tpu.memory_space<vmem>>, %arg2: memref<128x128xf32, #tpu.memory_space<vmem>>, %arg3: memref<1x128xf32, #tpu.memory_space<vmem>>, %arg4: memref<1x128xf32, #tpu.memory_space<vmem>>, %arg5: memref<1x128xf32, #tpu.memory_space<vmem>>, %arg6: memref<128x4xf32, #tpu.memory_space<vmem>>, %arg7: memref<1x4xf32, #tpu.memory_space<vmem>>, %arg8: memref<128x512xbf16, #tpu.memory_space<vmem>>, %arg9: memref<1x512xf32, #tpu.memory_space<vmem>>, %arg10: memref<512x128xbf16, #tpu.memory_space<vmem>>, %arg11: memref<4x128xf32, #tpu.memory_space<vmem>>, %arg12: memref<1x128xf32, #tpu.memory_space<vmem>>, %arg13: memref<1x128xf32, #tpu.memory_space<vmem>>, %arg14: memref<1x128xf32, #tpu.memory_space<vmem>>, %arg15: memref<1x128xf32, #tpu.memory_space<vmem>>, %arg16: memref<128x128xbf16, #tpu.memory_space<vmem>>, %arg17: memref<1x128xf32, #tpu.memory_space<vmem>>, %arg18: memref<128x128xbf16, #tpu.memory_space<vmem>>, %arg19: memref<1x128xf32, #tpu.memory_space<vmem>>, %arg20: memref<16x128xf32, #tpu.memory_space<vmem>>, %arg21: memref<16x128xf32, #tpu.memory_space<vmem>>, %arg22: memref<32x128xf32, #tpu.memory_space<vmem>>) attributes {dimension_semantics = [#tpu.dimension_semantics<parallel>], iteration_bounds = array<i64: 1>, scalar_prefetch = 0 : i64, scratch_operands = 1 : i64, tpu.core_type = #tpu.core_type<tc>, window_params = [{transform_indices = @transform_0, window_bounds = array<i64: 16, 128>}, {pipeline_mode = #tpu.pipeline_mode<synchronous>, transform_indices = @transform_1, window_bounds = array<i64: 128, 128>}, {pipeline_mode = #tpu.pipeline_mode<synchronous>, transform_indices = @transform_2, window_bounds = array<i64: 1, 128>}, {pipeline_mode = #tpu.pipeline_mode<synchronous>, transform_indices = @transform_3, window_bounds = array<i64: 1, 128>}, {pipeline_mode = #tpu.pipeline_mode<synchronous>, transform_indices = @transform_4, window_bounds = array<i64: 1, 128>}, {pipeline_mode = #tpu.pipeline_mode<synchronous>, transform_indices = @transform_5, window_bounds = array<i64: 128, 4>}, {pipeline_mode = #tpu.pipeline_mode<synchronous>, transform_indices = @transform_6, window_bounds = array<i64: 1, 4>}, {pipeline_mode = #tpu.pipeline_mode<synchronous>, transform_indices = @transform_7, window_bounds = array<i64: 128, 512>}, {pipeline_mode = #tpu.pipeline_mode<synchronous>, transform_indices = @transform_8, window_bounds = array<i64: 1, 512>}, {pipeline_mode = #tpu.pipeline_mode<synchronous>, transform_indices = @transform_9, window_bounds = array<i64: 512, 128>}, {pipeline_mode = #tpu.pipeline_mode<synchronous>, transform_indices = @transform_10, window_bounds = array<i64: 4, 128>}, {pipeline_mode = #tpu.pipeline_mode<synchronous>, transform_indices = @transform_11, window_bounds = array<i64: 1, 128>}, {pipeline_mode = #tpu.pipeline_mode<synchronous>, transform_indices = @transform_12, window_bounds = array<i64: 1, 128>}, {pipeline_mode = #tpu.pipeline_mode<synchronous>, transform_indices = @transform_13, window_bounds = array<i64: 1, 128>}, {pipeline_mode = #tpu.pipeline_mode<synchronous>, transform_indices = @transform_14, window_bounds = array<i64: 1, 128>}, {pipeline_mode = #tpu.pipeline_mode<synchronous>, transform_indices = @transform_15, window_bounds = array<i64: 128, 128>}, {pipeline_mode = #tpu.pipeline_mode<synchronous>, transform_indices = @transform_16, window_bounds = array<i64: 1, 128>}, {pipeline_mode = #tpu.pipeline_mode<synchronous>, transform_indices = @transform_17, window_bounds = array<i64: 128, 128>}, {pipeline_mode = #tpu.pipeline_mode<synchronous>, transform_indices = @transform_18, window_bounds = array<i64: 1, 128>}, {transform_indices = @transform_19, window_bounds = array<i64: 16, 128>}, {transform_indices = @transform_20, window_bounds = array<i64: 16, 128>}]} {
    %c0 = arith.constant 0 : index
    %c0_0 = arith.constant 0 : index
    %0 = vector.load %arg1[%c0, %c0_0] : memref<16x128xf32, #tpu.memory_space<vmem>>, vector<16x128xf32>
    %c0_1 = arith.constant 0 : index
    %c0_2 = arith.constant 0 : index
    %1 = vector.load %arg2[%c0_1, %c0_2] : memref<128x128xf32, #tpu.memory_space<vmem>>, vector<128x128xf32>
    %cst = arith.constant dense<0.000000e+00> : vector<16x128xf32>
    %2 = tpu.matmul %0, %1, %cst {dimension_numbers = #tpu.dot_dimension_numbers<[1], [0], [0], [1], [0, 0, 1, 1], [], []>} : vector<16x128xf32>, vector<128x128xf32>, vector<16x128xf32> -> vector<16x128xf32>
    %c0_3 = arith.constant 0 : index
    %c0_4 = arith.constant 0 : index
    %3 = vector.load %arg3[%c0_3, %c0_4] : memref<1x128xf32, #tpu.memory_space<vmem>>, vector<1x128xf32>
    %4 = vector.broadcast %3 : vector<1x128xf32> to vector<16x128xf32>
    %5 = arith.addf %2, %4 : vector<16x128xf32>
    %cst_5 = arith.constant 5.000000e-01 : f32
    %6 = vector.broadcast %cst_5 : f32 to vector<16x128xf32>
    %7 = arith.mulf %6, %5 : vector<16x128xf32>
    %cst_6 = arith.constant 4.471500e-02 : f32
    %8 = vector.broadcast %cst_6 : f32 to vector<16x128xf32>
    %9 = arith.mulf %8, %5 : vector<16x128xf32>
    %10 = arith.mulf %9, %5 : vector<16x128xf32>
    %11 = arith.mulf %10, %5 : vector<16x128xf32>
    %12 = arith.addf %5, %11 : vector<16x128xf32>
    %cst_7 = arith.constant 0.797884583 : f32
    %13 = vector.broadcast %cst_7 : f32 to vector<16x128xf32>
    %14 = arith.mulf %13, %12 : vector<16x128xf32>
    %15 = math.tanh %14 : vector<16x128xf32>
    %cst_8 = arith.constant 1.000000e+00 : f32
    %16 = vector.broadcast %cst_8 : f32 to vector<16x128xf32>
    %17 = arith.addf %16, %15 : vector<16x128xf32>
    %18 = arith.mulf %7, %17 : vector<16x128xf32>
    %c0_9 = arith.constant 0 : index
    %c0_10 = arith.constant 0 : index
    %19 = vector.load %arg4[%c0_9, %c0_10] : memref<1x128xf32, #tpu.memory_space<vmem>>, vector<1x128xf32>
    %20 = vector.broadcast %19 : vector<1x128xf32> to vector<16x128xf32>
    %21 = arith.addf %18, %20 : vector<16x128xf32>
    %c0_11 = arith.constant 0 : index
    %c0_12 = arith.constant 0 : index
    %22 = vector.load %arg22[%c0_11, %c0_12] : memref<32x128xf32, #tpu.memory_space<vmem>>, vector<16x128xf32>
    tpu.vector_store %arg22[%c0_11, %c0_12], %21 {strides = array<i32>} : memref<32x128xf32, #tpu.memory_space<vmem>>, vector<16x128xf32>,
    %c0_13 = arith.constant 0 : index
    %c0_14 = arith.constant 0 : index
    %23 = vector.load %arg5[%c0_13, %c0_14] : memref<1x128xf32, #tpu.memory_space<vmem>>, vector<1x128xf32>
    %24 = vector.broadcast %23 : vector<1x128xf32> to vector<16x128xf32>
    %25 = arith.addf %18, %24 : vector<16x128xf32>
    %c16 = arith.constant 16 : index
    %c0_15 = arith.constant 0 : index
    %26 = vector.load %arg22[%c16, %c0_15] : memref<32x128xf32, #tpu.memory_space<vmem>>, vector<16x128xf32>
    tpu.vector_store %arg22[%c16, %c0_15], %25 {strides = array<i32>} : memref<32x128xf32, #tpu.memory_space<vmem>>, vector<16x128xf32>,
    %c0_16 = arith.constant 0 : index
    %c0_17 = arith.constant 0 : index
    %27 = vector.load %arg22[%c0_16, %c0_17] : memref<32x128xf32, #tpu.memory_space<vmem>>, vector<32x128xf32>
    %c0_18 = arith.constant 0 : index
    %c0_19 = arith.constant 0 : index
    %28 = vector.load %arg6[%c0_18, %c0_19] : memref<128x4xf32, #tpu.memory_space<vmem>>, vector<128x4xf32>
    %c0_20 = arith.constant 0 : index
    %c0_21 = arith.constant 0 : index
    %29 = vector.load %arg7[%c0_20, %c0_21] : memref<1x4xf32, #tpu.memory_space<vmem>>, vector<1x4xf32>
    %c0_22 = arith.constant 0 : index
    %c0_23 = arith.constant 0 : index
    %30 = vector.load %arg8[%c0_22, %c0_23] : memref<128x512xbf16, #tpu.memory_space<vmem>>, vector<128x512xbf16>
    %c0_24 = arith.constant 0 : index
    %c0_25 = arith.constant 0 : index
    %31 = vector.load %arg9[%c0_24, %c0_25] : memref<1x512xf32, #tpu.memory_space<vmem>>, vector<1x512xf32>
    %c0_26 = arith.constant 0 : index
    %c0_27 = arith.constant 0 : index
    %32 = vector.load %arg10[%c0_26, %c0_27] : memref<512x128xbf16, #tpu.memory_space<vmem>>, vector<512x128xbf16>
    %c0_28 = arith.constant 0 : index
    %c0_29 = arith.constant 0 : index
    %33 = vector.load %arg11[%c0_28, %c0_29] : memref<4x128xf32, #tpu.memory_space<vmem>>, vector<4x128xf32>
    %cst_30 = arith.constant dense<0.000000e+00> : vector<32x4xf32>
    %34 = tpu.matmul %27, %28, %cst_30 {dimension_numbers = #tpu.dot_dimension_numbers<[1], [0], [0], [1], [0, 0, 1, 1], [], []>} : vector<32x128xf32>, vector<128x4xf32>, vector<32x4xf32> -> vector<32x4xf32>
    %35 = vector.broadcast %29 : vector<1x4xf32> to vector<32x4xf32>
    %36 = arith.addf %34, %35 : vector<32x4xf32>
    %cst_31 = arith.constant dense<0xFF800000> : vector<32xf32>
    %37 = vector.multi_reduction <maximumf>, %36, %cst_31 [1] : vector<32x4xf32> to vector<32xf32>
    %38 = vector.shape_cast %37 : vector<32xf32> to vector<32x1xf32>
    %39 = vector.broadcast %38 : vector<32x1xf32> to vector<32x4xf32>
    %40 = arith.subf %36, %39 : vector<32x4xf32>
    %41 = math.exp %40 : vector<32x4xf32>
    %cst_32 = arith.constant dense<0.000000e+00> : vector<32xf32>
    %42 = vector.multi_reduction <add>, %41, %cst_32 [1] : vector<32x4xf32> to vector<32xf32>
    %43 = vector.shape_cast %42 : vector<32xf32> to vector<32x1xf32>
    %44 = vector.broadcast %43 : vector<32x1xf32> to vector<32x4xf32>
    %45 = arith.divf %41, %44 : vector<32x4xf32>
    %46 = tpu.iota {dimensions = array<i32: 1>} : vector<32x4xi32>
    %cst_33 = arith.constant 0.000000e+00 : f32
    %47 = vector.broadcast %cst_33 : f32 to vector<32x4xf32>
    %cst_34 = arith.constant dense<0xFF800000> : vector<32xf32>
    %48 = vector.multi_reduction <maximumf>, %45, %cst_34 [1] : vector<32x4xf32> to vector<32xf32>
    %49 = vector.shape_cast %48 : vector<32xf32> to vector<32x1xf32>
    %50 = vector.broadcast %49 : vector<32x1xf32> to vector<32x4xf32>
    %51 = arith.cmpf oeq, %45, %50 : vector<32x4xf32>
    %c4_i32 = arith.constant 4 : i32
    %52 = vector.broadcast %c4_i32 : i32 to vector<32x4xi32>
    %53 = arith.select %51, %46, %52 : vector<32x4xi1>, vector<32x4xi32>
    %cst_35 = arith.constant dense<2147483647> : vector<32xi32>
    %54 = vector.multi_reduction <minsi>, %53, %cst_35 [1] : vector<32x4xi32> to vector<32xi32>
    %55 = vector.shape_cast %54 : vector<32xi32> to vector<32x1xi32>
    %56 = vector.broadcast %55 : vector<32x1xi32> to vector<32x4xi32>
    %57 = arith.cmpi eq, %46, %56 : vector<32x4xi32>
    %58 = arith.select %57, %45, %47 : vector<32x4xi1>, vector<32x4xf32>
    %cst_36 = arith.constant -1.000000e+30 : f32
    %59 = vector.broadcast %cst_36 : f32 to vector<32x4xf32>
    %60 = arith.select %57, %59, %45 : vector<32x4xi1>, vector<32x4xf32>
    %cst_37 = arith.constant dense<0xFF800000> : vector<32xf32>
    %61 = vector.multi_reduction <maximumf>, %60, %cst_37 [1] : vector<32x4xf32> to vector<32xf32>
    %62 = vector.shape_cast %61 : vector<32xf32> to vector<32x1xf32>
    %63 = vector.broadcast %62 : vector<32x1xf32> to vector<32x4xf32>
    %64 = arith.cmpf oeq, %60, %63 : vector<32x4xf32>
    %c4_i32_38 = arith.constant 4 : i32
    %65 = vector.broadcast %c4_i32_38 : i32 to vector<32x4xi32>
    %66 = arith.select %64, %46, %65 : vector<32x4xi1>, vector<32x4xi32>
    %cst_39 = arith.constant dense<2147483647> : vector<32xi32>
    %67 = vector.multi_reduction <minsi>, %66, %cst_39 [1] : vector<32x4xi32> to vector<32xi32>
    %68 = vector.shape_cast %67 : vector<32xi32> to vector<32x1xi32>
    %69 = vector.broadcast %68 : vector<32x1xi32> to vector<32x4xi32>
    %70 = arith.cmpi eq, %46, %69 : vector<32x4xi32>
    %71 = arith.select %70, %45, %58 : vector<32x4xi1>, vector<32x4xf32>
    %72 = arith.truncf %27 : vector<32x128xf32> to vector<32x128xbf16>
    %cst_40 = arith.constant dense<0.000000e+00> : vector<32x512xf32>
    %73 = tpu.matmul %72, %30, %cst_40 {dimension_numbers = #tpu.dot_dimension_numbers<[1], [0], [0], [1], [0, 0, 1, 1], [], []>} : vector<32x128xbf16>, vector<128x512xbf16>, vector<32x512xf32> -> vector<32x512xf32>
    %74 = vector.broadcast %31 : vector<1x512xf32> to vector<32x512xf32>
    %75 = arith.addf %73, %74 : vector<32x512xf32>
    %76 = arith.truncf %75 : vector<32x512xf32> to vector<32x512xbf16>
    %cst_41 = arith.constant 5.000000e-01 : bf16
    %77 = vector.broadcast %cst_41 : bf16 to vector<32x512xbf16>
    %78 = arith.mulf %77, %76 : vector<32x512xbf16>
    %cst_42 = arith.constant 4.467770e-02 : bf16
    %79 = vector.broadcast %cst_42 : bf16 to vector<32x512xbf16>
    %80 = arith.mulf %79, %76 : vector<32x512xbf16>
    %81 = arith.mulf %80, %76 : vector<32x512xbf16>
    %82 = arith.mulf %81, %76 : vector<32x512xbf16>
    %83 = arith.addf %76, %82 : vector<32x512xbf16>
    %cst_43 = arith.constant 7.968750e-01 : bf16
    %84 = vector.broadcast %cst_43 : bf16 to vector<32x512xbf16>
    %85 = arith.mulf %84, %83 : vector<32x512xbf16>
    %86 = math.tanh %85 : vector<32x512xbf16>
    %cst_44 = arith.constant 1.000000e+00 : bf16
    %87 = vector.broadcast %cst_44 : bf16 to vector<32x512xbf16>
    %88 = arith.addf %87, %86 : vector<32x512xbf16>
    %89 = arith.mulf %78, %88 : vector<32x512xbf16>
    %90 = vector.extract_strided_slice %89 {offsets = [0, 0], sizes = [32, 128], strides = [1, 1]} : vector<32x512xbf16> to vector<32x128xbf16>
    %91 = vector.extract_strided_slice %71 {offsets = [0, 0], sizes = [32, 1], strides = [1, 1]} : vector<32x4xf32> to vector<32x1xf32>
    %92 = arith.truncf %91 : vector<32x1xf32> to vector<32x1xbf16>
    %93 = vector.broadcast %92 : vector<32x1xbf16> to vector<32x128xbf16>
    %94 = arith.mulf %90, %93 : vector<32x128xbf16>
    %95 = vector.extract_strided_slice %89 {offsets = [0, 128], sizes = [32, 128], strides = [1, 1]} : vector<32x512xbf16> to vector<32x128xbf16>
    %96 = vector.extract_strided_slice %71 {offsets = [0, 1], sizes = [32, 1], strides = [1, 1]} : vector<32x4xf32> to vector<32x1xf32>
    %97 = arith.truncf %96 : vector<32x1xf32> to vector<32x1xbf16>
    %98 = vector.broadcast %97 : vector<32x1xbf16> to vector<32x128xbf16>
    %99 = arith.mulf %95, %98 : vector<32x128xbf16>
    %100 = vector.extract_strided_slice %89 {offsets = [0, 256], sizes = [32, 128], strides = [1, 1]} : vector<32x512xbf16> to vector<32x128xbf16>
    %101 = vector.extract_strided_slice %71 {offsets = [0, 2], sizes = [32, 1], strides = [1, 1]} : vector<32x4xf32> to vector<32x1xf32>
    %102 = arith.truncf %101 : vector<32x1xf32> to vector<32x1xbf16>
    %103 = vector.broadcast %102 : vector<32x1xbf16> to vector<32x128xbf16>
    %104 = arith.mulf %100, %103 : vector<32x128xbf16>
    %105 = vector.extract_strided_slice %89 {offsets = [0, 384], sizes = [32, 128], strides = [1, 1]} : vector<32x512xbf16> to vector<32x128xbf16>
    %106 = vector.extract_strided_slice %71 {offsets = [0, 3], sizes = [32, 1], strides = [1, 1]} : vector<32x4xf32> to vector<32x1xf32>
    %107 = arith.truncf %106 : vector<32x1xf32> to vector<32x1xbf16>
    %108 = vector.broadcast %107 : vector<32x1xbf16> to vector<32x128xbf16>
    %109 = arith.mulf %105, %108 : vector<32x128xbf16>
    %110 = tpu.concatenate %94, %99, %104, %109 in 1 : vector<32x128xbf16>, vector<32x128xbf16>, vector<32x128xbf16>, vector<32x128xbf16> -> vector<32x512xbf16>
    %cst_45 = arith.constant dense<0.000000e+00> : vector<32x128xf32>
    %111 = tpu.matmul %110, %32, %cst_45 {dimension_numbers = #tpu.dot_dimension_numbers<[1], [0], [0], [1], [0, 0, 1, 1], [], []>} : vector<32x512xbf16>, vector<512x128xbf16>, vector<32x128xf32> -> vector<32x128xf32>
    %cst_46 = arith.constant dense<0.000000e+00> : vector<32x128xf32>
    %112 = tpu.matmul %71, %33, %cst_46 {dimension_numbers = #tpu.dot_dimension_numbers<[1], [0], [0], [1], [0, 0, 1, 1], [], []>} : vector<32x4xf32>, vector<4x128xf32>, vector<32x128xf32> -> vector<32x128xf32>
    %113 = arith.addf %111, %112 : vector<32x128xf32>
    %c0_47 = arith.constant 0 : index
    %c0_48 = arith.constant 0 : index
    %114 = vector.load %arg22[%c0_47, %c0_48] : memref<32x128xf32, #tpu.memory_space<vmem>>, vector<16x128xf32>
    %c16_49 = arith.constant 16 : index
    %c0_50 = arith.constant 0 : index
    %115 = vector.load %arg22[%c16_49, %c0_50] : memref<32x128xf32, #tpu.memory_space<vmem>>, vector<16x128xf32>
    %c0_51 = arith.constant 0 : index
    %c0_52 = arith.constant 0 : index
    %116 = vector.load %arg12[%c0_51, %c0_52] : memref<1x128xf32, #tpu.memory_space<vmem>>, vector<1x128xf32>
    %c0_53 = arith.constant 0 : index
    %c0_54 = arith.constant 0 : index
    %117 = vector.load %arg13[%c0_53, %c0_54] : memref<1x128xf32, #tpu.memory_space<vmem>>, vector<1x128xf32>
    %c0_55 = arith.constant 0 : index
    %c0_56 = arith.constant 0 : index
    %118 = vector.load %arg14[%c0_55, %c0_56] : memref<1x128xf32, #tpu.memory_space<vmem>>, vector<1x128xf32>
    %c0_57 = arith.constant 0 : index
    %c0_58 = arith.constant 0 : index
    %119 = vector.load %arg15[%c0_57, %c0_58] : memref<1x128xf32, #tpu.memory_space<vmem>>, vector<1x128xf32>
    %c0_59 = arith.constant 0 : index
    %c0_60 = arith.constant 0 : index
    %120 = vector.load %arg16[%c0_59, %c0_60] : memref<128x128xbf16, #tpu.memory_space<vmem>>, vector<128x128xbf16>
    %c0_61 = arith.constant 0 : index
    %c0_62 = arith.constant 0 : index
    %121 = vector.load %arg17[%c0_61, %c0_62] : memref<1x128xf32, #tpu.memory_space<vmem>>, vector<1x128xf32>
    %c0_63 = arith.constant 0 : index
    %c0_64 = arith.constant 0 : index
    %122 = vector.load %arg18[%c0_63, %c0_64] : memref<128x128xbf16, #tpu.memory_space<vmem>>, vector<128x128xbf16>
    %c0_65 = arith.constant 0 : index
    %c0_66 = arith.constant 0 : index
    %123 = vector.load %arg19[%c0_65, %c0_66] : memref<1x128xf32, #tpu.memory_space<vmem>>, vector<1x128xf32>
    %cst_67 = arith.constant dense<0.000000e+00> : vector<32xf32>
    %124 = vector.multi_reduction <add>, %113, %cst_67 [1] : vector<32x128xf32> to vector<32xf32>
    %125 = vector.shape_cast %124 : vector<32xf32> to vector<32x1xf32>
    %cst_68 = arith.constant 1.280000e+02 : f32
    %126 = vector.broadcast %cst_68 : f32 to vector<32x1xf32>
    %127 = arith.divf %125, %126 : vector<32x1xf32>
    %128 = vector.broadcast %127 : vector<32x1xf32> to vector<32x128xf32>
    %129 = arith.subf %113, %128 : vector<32x128xf32>
    %130 = arith.mulf %129, %129 : vector<32x128xf32>
    %cst_69 = arith.constant dense<0.000000e+00> : vector<32xf32>
    %131 = vector.multi_reduction <add>, %130, %cst_69 [1] : vector<32x128xf32> to vector<32xf32>
    %132 = vector.shape_cast %131 : vector<32xf32> to vector<32x1xf32>
    %cst_70 = arith.constant 1.280000e+02 : f32
    %133 = vector.broadcast %cst_70 : f32 to vector<32x1xf32>
    %134 = arith.divf %132, %133 : vector<32x1xf32>
    %135 = vector.broadcast %127 : vector<32x1xf32> to vector<32x128xf32>
    %136 = arith.subf %113, %135 : vector<32x128xf32>
    %cst_71 = arith.constant 9.99999974E-6 : f32
    %137 = vector.broadcast %cst_71 : f32 to vector<32x1xf32>
    %138 = arith.addf %134, %137 : vector<32x1xf32>
    %139 = math.rsqrt %138 : vector<32x1xf32>
    %140 = vector.broadcast %139 : vector<32x1xf32> to vector<32x128xf32>
    %141 = arith.mulf %136, %140 : vector<32x128xf32>
    %142 = vector.extract_strided_slice %141 {offsets = [0, 0], sizes = [16, 128], strides = [1, 1]} : vector<32x128xf32> to vector<16x128xf32>
    %143 = vector.broadcast %116 : vector<1x128xf32> to vector<16x128xf32>
    %144 = arith.mulf %142, %143 : vector<16x128xf32>
    %145 = vector.broadcast %117 : vector<1x128xf32> to vector<16x128xf32>
    %146 = arith.addf %144, %145 : vector<16x128xf32>
    %cst_72 = arith.constant 5.000000e-01 : f32
    %147 = vector.broadcast %cst_72 : f32 to vector<16x128xf32>
    %148 = arith.mulf %147, %146 : vector<16x128xf32>
    %cst_73 = arith.constant 4.471500e-02 : f32
    %149 = vector.broadcast %cst_73 : f32 to vector<16x128xf32>
    %150 = arith.mulf %149, %146 : vector<16x128xf32>
    %151 = arith.mulf %150, %146 : vector<16x128xf32>
    %152 = arith.mulf %151, %146 : vector<16x128xf32>
    %153 = arith.addf %146, %152 : vector<16x128xf32>
    %cst_74 = arith.constant 0.797884583 : f32
    %154 = vector.broadcast %cst_74 : f32 to vector<16x128xf32>
    %155 = arith.mulf %154, %153 : vector<16x128xf32>
    %156 = math.tanh %155 : vector<16x128xf32>
    %cst_75 = arith.constant 1.000000e+00 : f32
    %157 = vector.broadcast %cst_75 : f32 to vector<16x128xf32>
    %158 = arith.addf %157, %156 : vector<16x128xf32>
    %159 = arith.mulf %148, %158 : vector<16x128xf32>
    %160 = arith.addf %159, %114 : vector<16x128xf32>
    %161 = vector.extract_strided_slice %141 {offsets = [16, 0], sizes = [16, 128], strides = [1, 1]} : vector<32x128xf32> to vector<16x128xf32>
    %162 = vector.broadcast %118 : vector<1x128xf32> to vector<16x128xf32>
    %163 = arith.mulf %161, %162 : vector<16x128xf32>
    %164 = vector.broadcast %119 : vector<1x128xf32> to vector<16x128xf32>
    %165 = arith.addf %163, %164 : vector<16x128xf32>
    %cst_76 = arith.constant 5.000000e-01 : f32
    %166 = vector.broadcast %cst_76 : f32 to vector<16x128xf32>
    %167 = arith.mulf %166, %165 : vector<16x128xf32>
    %cst_77 = arith.constant 4.471500e-02 : f32
    %168 = vector.broadcast %cst_77 : f32 to vector<16x128xf32>
    %169 = arith.mulf %168, %165 : vector<16x128xf32>
    %170 = arith.mulf %169, %165 : vector<16x128xf32>
    %171 = arith.mulf %170, %165 : vector<16x128xf32>
    %172 = arith.addf %165, %171 : vector<16x128xf32>
    %cst_78 = arith.constant 0.797884583 : f32
    %173 = vector.broadcast %cst_78 : f32 to vector<16x128xf32>
    %174 = arith.mulf %173, %172 : vector<16x128xf32>
    %175 = math.tanh %174 : vector<16x128xf32>
    %cst_79 = arith.constant 1.000000e+00 : f32
    %176 = vector.broadcast %cst_79 : f32 to vector<16x128xf32>
    %177 = arith.addf %176, %175 : vector<16x128xf32>
    %178 = arith.mulf %167, %177 : vector<16x128xf32>
    %179 = arith.addf %178, %115 : vector<16x128xf32>
    %180 = arith.truncf %160 : vector<16x128xf32> to vector<16x128xbf16>
    %cst_80 = arith.constant dense<0.000000e+00> : vector<16x128xf32>
    %181 = tpu.matmul %180, %120, %cst_80 {dimension_numbers = #tpu.dot_dimension_numbers<[1], [0], [0], [1], [0, 0, 1, 1], [], []>} : vector<16x128xbf16>, vector<128x128xbf16>, vector<16x128xf32> -> vector<16x128xf32>
    %182 = vector.broadcast %121 : vector<1x128xf32> to vector<16x128xf32>
    %183 = arith.addf %181, %182 : vector<16x128xf32>
    %184 = arith.truncf %179 : vector<16x128xf32> to vector<16x128xbf16>
    %cst_81 = arith.constant dense<0.000000e+00> : vector<16x128xf32>
    %185 = tpu.matmul %184, %122, %cst_81 {dimension_numbers = #tpu.dot_dimension_numbers<[1], [0], [0], [1], [0, 0, 1, 1], [], []>} : vector<16x128xbf16>, vector<128x128xbf16>, vector<16x128xf32> -> vector<16x128xf32>
    %186 = vector.broadcast %123 : vector<1x128xf32> to vector<16x128xf32>
    %187 = arith.addf %185, %186 : vector<16x128xf32>
    %c0_82 = arith.constant 0 : index
    %c0_83 = arith.constant 0 : index
    %188 = vector.load %arg20[%c0_82, %c0_83] : memref<16x128xf32, #tpu.memory_space<vmem>>, vector<16x128xf32>
    tpu.vector_store %arg20[%c0_82, %c0_83], %183 {strides = array<i32>} : memref<16x128xf32, #tpu.memory_space<vmem>>, vector<16x128xf32>,
    %c0_84 = arith.constant 0 : index
    %c0_85 = arith.constant 0 : index
    %189 = vector.load %arg21[%c0_84, %c0_85] : memref<16x128xf32, #tpu.memory_space<vmem>>, vector<16x128xf32>
    tpu.vector_store %arg21[%c0_84, %c0_85], %187 {strides = array<i32>} : memref<16x128xf32, #tpu.memory_space<vmem>>, vector<16x128xf32>,
    return
  }
  func.func @transform_0(%arg0: i32) -> (i32, i32) {
    %c0_i32 = arith.constant 0 : i32
    %c0_i32_0 = arith.constant 0 : i32
    return %arg0, %c0_i32 : i32, i32
  }
  func.func @transform_1(%arg0: i32) -> (i32, i32) {
    %c0_i32 = arith.constant 0 : i32
    %c0_i32_0 = arith.constant 0 : i32
    %c0_i32_1 = arith.constant 0 : i32
    return %c0_i32, %c0_i32_0 : i32, i32
  }
  func.func @transform_2(%arg0: i32) -> (i32, i32) {
    %c0_i32 = arith.constant 0 : i32
    %c0_i32_0 = arith.constant 0 : i32
    %c0_i32_1 = arith.constant 0 : i32
    return %c0_i32, %c0_i32_0 : i32, i32
  }
  func.func @transform_3(%arg0: i32) -> (i32, i32) {
    %c0_i32 = arith.constant 0 : i32
    %c0_i32_0 = arith.constant 0 : i32
    %c0_i32_1 = arith.constant 0 : i32
    return %c0_i32, %c0_i32_0 : i32, i32
  }
  func.func @transform_4(%arg0: i32) -> (i32, i32) {
    %c0_i32 = arith.constant 0 : i32
    %c0_i32_0 = arith.constant 0 : i32
    %c0_i32_1 = arith.constant 0 : i32
    return %c0_i32, %c0_i32_0 : i32, i32
  }
  func.func @transform_5(%arg0: i32) -> (i32, i32) {
    %c0_i32 = arith.constant 0 : i32
    %c0_i32_0 = arith.constant 0 : i32
    %c0_i32_1 = arith.constant 0 : i32
    return %c0_i32, %c0_i32_0 : i32, i32
  }
  func.func @transform_6(%arg0: i32) -> (i32, i32) {
    %c0_i32 = arith.constant 0 : i32
    %c0_i32_0 = arith.constant 0 : i32
    %c0_i32_1 = arith.constant 0 : i32
    return %c0_i32, %c0_i32_0 : i32, i32
  }
  func.func @transform_7(%arg0: i32) -> (i32, i32) {
    %c0_i32 = arith.constant 0 : i32
    %c0_i32_0 = arith.constant 0 : i32
    %c0_i32_1 = arith.constant 0 : i32
    return %c0_i32, %c0_i32_0 : i32, i32
  }
  func.func @transform_8(%arg0: i32) -> (i32, i32) {
    %c0_i32 = arith.constant 0 : i32
    %c0_i32_0 = arith.constant 0 : i32
    %c0_i32_1 = arith.constant 0 : i32
    return %c0_i32, %c0_i32_0 : i32, i32
  }
  func.func @transform_9(%arg0: i32) -> (i32, i32) {
    %c0_i32 = arith.constant 0 : i32
    %c0_i32_0 = arith.constant 0 : i32
    %c0_i32_1 = arith.constant 0 : i32
    return %c0_i32, %c0_i32_0 : i32, i32
  }
  func.func @transform_10(%arg0: i32) -> (i32, i32) {
    %c0_i32 = arith.constant 0 : i32
    %c0_i32_0 = arith.constant 0 : i32
    %c0_i32_1 = arith.constant 0 : i32
    return %c0_i32, %c0_i32_0 : i32, i32
  }
  func.func @transform_11(%arg0: i32) -> (i32, i32) {
    %c0_i32 = arith.constant 0 : i32
    %c0_i32_0 = arith.constant 0 : i32
    %c0_i32_1 = arith.constant 0 : i32
    return %c0_i32, %c0_i32_0 : i32, i32
  }
  func.func @transform_12(%arg0: i32) -> (i32, i32) {
    %c0_i32 = arith.constant 0 : i32
    %c0_i32_0 = arith.constant 0 : i32
    %c0_i32_1 = arith.constant 0 : i32
    return %c0_i32, %c0_i32_0 : i32, i32
  }
  func.func @transform_13(%arg0: i32) -> (i32, i32) {
    %c0_i32 = arith.constant 0 : i32
    %c0_i32_0 = arith.constant 0 : i32
    %c0_i32_1 = arith.constant 0 : i32
    return %c0_i32, %c0_i32_0 : i32, i32
  }
  func.func @transform_14(%arg0: i32) -> (i32, i32) {
    %c0_i32 = arith.constant 0 : i32
    %c0_i32_0 = arith.constant 0 : i32
    %c0_i32_1 = arith.constant 0 : i32
    return %c0_i32, %c0_i32_0 : i32, i32
  }
  func.func @transform_15(%arg0: i32) -> (i32, i32) {
    %c0_i32 = arith.constant 0 : i32
    %c0_i32_0 = arith.constant 0 : i32
    %c0_i32_1 = arith.constant 0 : i32
    return %c0_i32, %c0_i32_0 : i32, i32
  }
  func.func @transform_16(%arg0: i32) -> (i32, i32) {
    %c0_i32 = arith.constant 0 : i32
    %c0_i32_0 = arith.constant 0 : i32
    %c0_i32_1 = arith.constant 0 : i32
    return %c0_i32, %c0_i32_0 : i32, i32
  }
  func.func @transform_17(%arg0: i32) -> (i32, i32) {
    %c0_i32 = arith.constant 0 : i32
    %c0_i32_0 = arith.constant 0 : i32
    %c0_i32_1 = arith.constant 0 : i32
    return %c0_i32, %c0_i32_0 : i32, i32
  }
  func.func @transform_18(%arg0: i32) -> (i32, i32) {
    %c0_i32 = arith.constant 0 : i32
    %c0_i32_0 = arith.constant 0 : i32
    %c0_i32_1 = arith.constant 0 : i32
    return %c0_i32, %c0_i32_0 : i32, i32
  }
  func.func @transform_19(%arg0: i32) -> (i32, i32) {
    %c0_i32 = arith.constant 0 : i32
    %c0_i32_0 = arith.constant 0 : i32
    return %arg0, %c0_i32 : i32, i32
  }
  func.func @transform_20(%arg0: i32) -> (i32, i32) {
    %c0_i32 = arith.constant 0 : i32
    %c0_i32_0 = arith.constant 0 : i32
    return %arg0, %c0_i32 : i32, i32
  }
}

</mosaic_0001>

<bundles_post_ra>
// kernel: tpu_custom_call.1
= control target key start
LH: loop header
LB: loop body
LE: loop exit
PB: predicated region body
PF: predicated region fallthrough
CT: control target
= control target key end

     0   :  { %s3164_s0 = inlined_call_operand.hbm [shape: f32[16,128], index: 0, kind: input, shape index: {}]   ;;  %s3165_s1 = inlined_call_operand.vmem [shape: f32[128,128], index: 1, kind: input, shape index: {}]   ;;  %s3166_s2 = inlined_call_operand.vmem [shape: f32[1,128], index: 2, kind: input, shape index: {}]   ;;  %s3167_s3 = inlined_call_operand.hbm [shape: f32[1,128], index: 3, kind: input, shape index: {}]   ;;  %s3168_s4 = inlined_call_operand.hbm [shape: f32[1,128], index: 4, kind: input, shape index: {}]   ;;  %s3169_s5 = inlined_call_operand.vmem [shape: f32[128,4], index: 5, kind: input, shape index: {}]   ;;  %s3170_s6 = inlined_call_operand.vmem [shape: f32[1,4], index: 6, kind: input, shape index: {}]   ;;  %s3171_s7 = inlined_call_operand.hbm [shape: bf16[128,512], index: 7, kind: input, shape index: {}]   ;;  %s3172_s8 = inlined_call_operand.vmem [shape: f32[1,512], index: 8, kind: input, shape index: {}]   ;;  %s3173_s9 = inlined_call_operand.hbm [shape: bf16[512,128], index: 9, kind: input, shape index: {}]   ;;  %s3174_s10 = inlined_call_operand.vmem [shape: f32[4,128], index: 10, kind: input, shape index: {}]   ;;  %s3175_s11 = inlined_call_operand.vmem [shape: f32[1,128], index: 11, kind: input, shape index: {}]   ;;  %s3176_s12 = inlined_call_operand.vmem [shape: f32[1,128], index: 12, kind: input, shape index: {}]   ;;  %s3177_s13 = inlined_call_operand.vmem [shape: f32[1,128], index: 13, kind: input, shape index: {}]   ;;  %s3178_s14 = inlined_call_operand.vmem [shape: f32[1,128], index: 14, kind: input, shape index: {}]   ;;  %s3179_s15 = inlined_call_operand.hbm [shape: bf16[128,128], index: 15, kind: input, shape index: {}]   ;;  %s3180_s16 = inlined_call_operand.vmem [shape: f32[1,128], index: 16, kind: input, shape index: {}]   ;;  %s3181_s17 = inlined_call_operand.hbm [shape: bf16[128,128], index: 17, kind: input, shape index: {}]   ;;  %s3182_s18 = inlined_call_operand.vmem [shape: f32[1,128], index: 18, kind: input, shape index: {}]   ;;  %s3183_s19 = inlined_call_operand.hbm [shape: f32[16,128], index: 19, kind: output, shape index: {0}]   ;;  %s3184_s20 = inlined_call_operand.hbm [shape: f32[16,128], index: 20, kind: output, shape index: {1}]  }
   0x1   :  { %3186 = sst [smem:[#allocation24_spill]] %s3164_s0 }
   0x2   :  { %3187 = sst [smem:[#allocation25_spill]] %s3165_s1 }
   0x3   :  { %3188 = sst [smem:[#allocation26_spill]] %s3166_s2 }
   0x4   :  { %3189 = sst [smem:[#allocation27_spill]] %s3167_s3 }
   0x5   :  { %3190 = sst [smem:[#allocation28_spill]] %s3168_s4 }
   0x6   :  { %26 = vsyncpa [#allocation4], 0 }
   0x7   :  { %27 = vsyncpa [#allocation7], 0 }
   0x8   :  { %28 = vsyncpa [#allocation10], 0 }
   0x9   :  { %29 = vsyncpa [#allocation13], 0 }
   0xa   :  { %30 = vsyncpa [#allocation5], 0 }
   0xb   :  { %31 = vsyncpa [#allocation17], 0  ;;  %s2635_s1 = smov [#allocation6]   ;;  %s2636_s23 = smov [#allocation9]  }
   0xc   :  { %s54_s22 = sshll.u32 %s2635_s1, 4  ;;  %s77_s24 = sshll.u32 %s2636_s23, 4  ;;  %s55_s22 = int_to_ptr.vmem [resolvable:$true] %s54_s22  ;;  %s78_s24 = int_to_ptr.vmem [resolvable:$true] %s77_s24 }
   0xd   :  { %s2451_s2 = scalar_lea.vmem %s55_s22, 16  ;;  %s2455_s25 = scalar_lea.vmem %s55_s22, 32 }
   0xe   :  { %p2452_p0 = scmp.ne.s32.totalorder %s55_s22, %s2451_s2  ;;  %p2456_p1 = scmp.lt.s32.totalorder %s55_s22, %s55_s22 }
   0xf   :  { %p2457_p2 = scmp.lt.s32.totalorder %s2455_s25, %s2451_s2 }
  0x11   :  { %p2458_p3 = por %p2457_p2, %p2456_p1 }
  0x13   :  { %p2459_p4 = pnand %p2458_p3, %p2452_p0 }
  0x15   :  { %2462 = shalt.err (!%p2459_p4)
}
  0x16   :  { %s3191_s27 = sld [smem:[#allocation27_spill]]  ;;  %s2471_s28 = scalar_lea.vmem %s78_s24, 4096 }
  0x17   :  { %p2472_p5 = scmp.ne.s32.totalorder %s78_s24, %s2471_s28  ;;  %p2476_p6 = scmp.lt.s32.totalorder %s78_s24, %s78_s24 }
  0x18   :  { %p2477_p7 = scmp.lt.s32.totalorder %s2471_s28, %s2471_s28 }
  0x1a   :  { %p2478_p8 = por %p2477_p7, %p2476_p6 }
  0x1c   :  { %57 = dma.hbm_to_vmem [thread:$0]  %s3191_s27, 16, %s55_s22, [#allocation7]  }
  0x1d   :  { %p2479_p9 = pnand %p2478_p8, %p2472_p5 }
  0x1f   :  { %2482 = shalt.err (!%p2479_p9)
}
  0x20   :  { %s2637_s4 = smov 256   ;;  %s2638_s29 = smov 16  }
  0x21   :  { %83 = dma.hbm_to_vmem [thread:$0]  %s3171_s7, 4096, %s78_s24, [#allocation10], %s2637_s4, %s2637_s4, %s2638_s29  }
  0x22   :  { %s2639_s21 = smov [#allocation12]   ;;  %s2640_s23 = smov [#allocation3]  }
  0x23   :  { %s113_s1 = sshll.u32 %s2639_s21, 4  ;;  %s37_s2 = sshll.u32 %s2640_s23, 4  ;;  %s114_s1 = int_to_ptr.vmem [resolvable:$true] %s113_s1  ;;  %s38_s2 = int_to_ptr.vmem [resolvable:$true] %s37_s2 }
  0x24   :  { %s2491_s22 = scalar_lea.vmem %s114_s1, 1024  ;;  %p2496_p11 = scmp.lt.s32.totalorder %s114_s1, %s114_s1 }
  0x25   :  { %p2492_p10 = scmp.ne.s32.totalorder %s114_s1, %s2491_s22  ;;  %p2497_p12 = scmp.lt.s32.totalorder %s2491_s22, %s2491_s22 }
  0x27   :  { %p2498_p13 = por %p2497_p12, %p2496_p11 }
  0x29   :  { %p2499_p0 = pnand %p2498_p13, %p2492_p10 }
  0x2b   :  { %2502 = shalt.err (!%p2499_p0)
}
  0x2c   :  { %s2641_s25 = smov 64   ;;  %s2642_s3 = smov 4  }
  0x2d   :  { %119 = dma.hbm_to_vmem [thread:$0]  %s3179_s15, 1024, %s114_s1, [#allocation13], %s2641_s25, %s2641_s25, %s2642_s3  }
  0x2e   :  { %s2511_s24 = scalar_lea.vmem %s38_s2, 256  ;;  %p2516_p2 = scmp.lt.s32.totalorder %s38_s2, %s38_s2 }
  0x2f   :  { %p2512_p1 = scmp.ne.s32.totalorder %s38_s2, %s2511_s24  ;;  %p2517_p3 = scmp.lt.s32.totalorder %s2511_s24, %s2511_s24 }
  0x31   :  { %p2518_p4 = por %p2517_p3, %p2516_p2 }
  0x33   :  { %p2519_p5 = pnand %p2518_p4, %p2512_p1 }
  0x35   :  { %2522 = shalt.err (!%p2519_p5)
}
  0x36   :  { %s2643_s27 = smov 128   ;;  %s2644_s28 = smov 8  }
  0x37   :  { %s3192_s30 = sld [smem:[#allocation24_spill]]  ;;  %s2645_s0 = smov [#allocation8]  }
  0x38   :  { %s64_s21 = sshll.u32 %s2645_s0, 4  ;;  %s2646_s23 = smov [#allocation11]   ;;  %s65_s21 = int_to_ptr.vmem [resolvable:$true] %s64_s21 }
  0x39   :  { %s91_s15 = sshll.u32 %s2646_s23, 4  ;;  %s2531_s1 = scalar_lea.vmem %s65_s21, 16  ;;  %s92_s15 = int_to_ptr.vmem [resolvable:$true] %s91_s15 }
  0x3a   :  { %p2532_p6 = scmp.ne.s32.totalorder %s65_s21, %s2531_s1  ;;  %s2535_s22 = scalar_lea.vmem %s65_s21, 32 }
  0x3b   :  { %p2536_p7 = scmp.lt.s32.totalorder %s65_s21, %s65_s21  ;;  %p2537_p8 = scmp.lt.s32.totalorder %s2535_s22, %s2531_s1 }
  0x3d   :  { %43 = dma.hbm_to_vmem [thread:$0]  %s3192_s30, 256, %s38_s2, [#allocation4], %s2643_s27, %s2643_s27, %s2644_s28  }
  0x3e   :  { %p2538_p9 = por %p2537_p8, %p2536_p7 }
  0x40   :  { %p2539_p10 = pnand %p2538_p9, %p2532_p6 }
  0x42   :  { %2542 = shalt.err (!%p2539_p10)
}
  0x43   :  { %s3193_s24 = sld [smem:[#allocation28_spill]]  ;;  %s2551_s4 = scalar_lea.vmem %s92_s15, 4096 }
  0x44   :  { %p2552_p11 = scmp.ne.s32.totalorder %s92_s15, %s2551_s4  ;;  %p2556_p12 = scmp.lt.s32.totalorder %s92_s15, %s92_s15 }
  0x45   :  { %p2557_p13 = scmp.lt.s32.totalorder %s2551_s4, %s2551_s4 }
  0x47   :  { %p2558_p0 = por %p2557_p13, %p2556_p12 }
  0x49   :  { %67 = dma.hbm_to_vmem [thread:$0]  %s3193_s24, 16, %s65_s21, [#allocation7]  }
  0x4a   :  { %p2559_p1 = pnand %p2558_p0, %p2552_p11 }
  0x4c   :  { %2562 = shalt.err (!%p2559_p1)
}
  0x4d   :  { %97 = dma.hbm_to_vmem [thread:$0]  %s3173_s9, 4096, %s92_s15, [#allocation10], %s2641_s25, %s2641_s25, %s2642_s3  }
  0x4e   :  { %s2647_s30 = smov [#allocation14]  }
  0x4f   :  { %s127_s0 = sshll.u32 %s2647_s30, 4  ;;  %s128_s0 = int_to_ptr.vmem [resolvable:$true] %s127_s0 }
  0x50   :  { %s2571_s23 = scalar_lea.vmem %s128_s0, 1024  ;;  %p2576_p3 = scmp.lt.s32.totalorder %s128_s0, %s128_s0 }
  0x51   :  { %p2572_p2 = scmp.ne.s32.totalorder %s128_s0, %s2571_s23  ;;  %p2577_p4 = scmp.lt.s32.totalorder %s2571_s23, %s2571_s23 }
  0x53   :  { %p2578_p5 = por %p2577_p4, %p2576_p3 }
  0x55   :  { %p2579_p6 = pnand %p2578_p5, %p2572_p2 }
  0x57   :  { %2582 = shalt.err (!%p2579_p6)
}
  0x58   :  { %133 = dma.hbm_to_vmem [thread:$0]  %s3181_s17, 1024, %s128_s0, [#allocation13], %s2641_s25, %s2641_s25, %s2642_s3  }
  0x59   :  { %2623 = dma.done.wait [#allocation4], 256  }
  0x5a   :  { %2624 = vsyncadd [#allocation4], 4294967040 }
  0x5b   :  { %2625 = dma.done.wait [#allocation7], 32  }
  0x5c   :  { %2626 = vsyncadd [#allocation7], 4294967264 }
  0x5d   :  { %2627 = dma.done.wait [#allocation10], 8192  }
  0x5e   :  { %2628 = vsyncadd [#allocation10], 4294959104 }
  0x5f   :  { %2629 = dma.done.wait [#allocation13], 2048  }
  0x60   :  { %2630 = vsyncadd [#allocation13], 4294965248  ;;  %s3194_s22 = sld [smem:[#allocation25_spill]]  ;;  %v162_v5 = vld [vmem:[#allocation3] sm:$0xff]  ;;  %v163_v17 = vld [vmem:[#allocation3 + $0x8] sm:$0xff]  ;;  %v2648_v51 = vmov 0  }
  0x61   :  { %2176 = vmatprep.mubr.f32.mxu0 %v162_v5  ;;  %v321_v18 = vld [vmem:[%s3169_s5 + $0x78] sm:$0xff]  ;;  %v320_v20 = vld [vmem:[%s3169_s5 + $0x70] sm:$0xff]  ;;  %v319_v22 = vld [vmem:[%s3169_s5 + $0x68] sm:$0xff]  ;;  %2287 = vset.pattern.permute.xlu1 %v2648_v51  ;;  %s3195_s9 = sld [smem:[#allocation26_spill]]  ;;  %vm512_vm0 = vcmask 31744   ;;  %s2654_s4 = smov [#allocation15]  }
  0x62   :  { %2179 = vmatprep.subr.mxu1 %v321_v18  ;;  %v2297_v19 = vld [vmem:[#allocation9 + $0xe4] ss:$16 sps:$4 sm:$0xff]   ;;  %v2295_v21 = vld [vmem:[#allocation9 + $0xe0] ss:$16 sps:$4 sm:$0xff]   ;;  %v2321_v50 = vld [vmem:[#allocation9 + $0xec] ss:$16 sps:$4 sm:$0xff]  }
  0x63   :  { %2180 = vmatpush3.msra.mxu1 %v321_v18  ;;  %v2300_v23 = vld [vmem:[#allocation9 + $0xc4] ss:$16 sps:$4 sm:$0xff]   ;;  %v318_v24 = vld [vmem:[%s3169_s5 + $0x60] sm:$0xff]  ;;  %v316_v27 = vld [vmem:[%s3169_s5 + $0x50] sm:$0xff]  ;;  %s1901_s2 = sshll.u32 %s2654_s4, 4  ;;  %s1902_s2 = int_to_ptr.vmem [resolvable:$true] %s1901_s2 }
  0x64   :  { %2181 = vmatprep.subr.mxu1 %v320_v20  ;;  %v2298_v25 = vld [vmem:[#allocation9 + $0xc0] ss:$16 sps:$4 sm:$0xff]   ;;  %v317_v26 = vld [vmem:[%s3169_s5 + $0x58] sm:$0xff]  ;;  %v315_v31 = vld [vmem:[%s3169_s5 + $0x48] sm:$0xff]  ;;  %s2583_s29 = scalar_lea.vmem %s1902_s2, 256  ;;  %p2588_p8 = scmp.lt.s32.totalorder %s1902_s2, %s1902_s2 }
  0x65   :  { %2182 = vmatpush3.msra.mxu1 %v320_v20  ;;  %v2301_v28 = vld [vmem:[#allocation9 + $0xa0] ss:$16 sps:$4 sm:$0xff]   ;;  %v2303_v29 = vld [vmem:[#allocation9 + $0xa4] ss:$16 sps:$4 sm:$0xff]   ;;  %p2584_p7 = scmp.ne.s32.totalorder %s1902_s2, %s2583_s29  ;;  %p2589_p9 = scmp.lt.s32.totalorder %s2583_s29, %s2583_s29 }
  0x66   :  { %v179_v0 = vld [vmem:[%s3194_s22 + $0x78] sm:$0xff]  ;;  %v178_v1 = vld [vmem:[%s3194_s22 + $0x70] sm:$0xff]  ;;  %v177_v2 = vld [vmem:[%s3194_s22 + $0x68] sm:$0xff]  ;;  %2183 = vmatprep.subr.mxu1 %v319_v22 }
  0x67   :  { %2144 = vmatprep.subr.mxu0 %v179_v0  ;;  %v176_v3 = vld [vmem:[%s3194_s22 + $0x60] sm:$0xff]  ;;  %v175_v4 = vld [vmem:[%s3194_s22 + $0x58] sm:$0xff]  ;;  %v174_v6 = vld [vmem:[%s3194_s22 + $0x50] sm:$0xff]  ;;  %2184 = vmatpush3.msra.mxu1 %v319_v22  ;;  %p2590_p10 = por %p2589_p9, %p2588_p8 }
  0x68   :  { %2145 = vmatpush3.msra.mxu0 %v179_v0  ;;  %v173_v7 = vld [vmem:[%s3194_s22 + $0x48] sm:$0xff]  ;;  %v172_v8 = vld [vmem:[%s3194_s22 + $0x40] sm:$0xff]  ;;  %v171_v9 = vld [vmem:[%s3194_s22 + $0x38] sm:$0xff]  ;;  %2185 = vmatprep.subr.mxu1 %v318_v24 }
  0x69   :  { %2146 = vmatprep.subr.mxu0 %v178_v1  ;;  %v170_v10 = vld [vmem:[%s3194_s22 + $0x30] sm:$0xff]  ;;  %v169_v11 = vld [vmem:[%s3194_s22 + $0x28] sm:$0xff]  ;;  %v168_v12 = vld [vmem:[%s3194_s22 + $0x20] sm:$0xff]  ;;  %2186 = vmatpush3.msra.mxu1 %v318_v24  ;;  %p2591_p11 = pnand %p2590_p10, %p2584_p7 }
  0x6a   :  { %2147 = vmatpush3.msra.mxu0 %v178_v1  ;;  %v167_v13 = vld [vmem:[%s3194_s22 + $0x18] sm:$0xff]  ;;  %v166_v14 = vld [vmem:[%s3194_s22 + $0x10] sm:$0xff]  ;;  %v165_v15 = vld [vmem:[%s3194_s22 + $0x8] sm:$0xff]  ;;  %2187 = vmatprep.subr.mxu1 %v317_v26 }
  0x6b   :  { %2148 = vmatprep.subr.mxu0 %v177_v2  ;;  %v164_v16 = vld [vmem:[%s3194_s22] sm:$0xff]  ;;  %v2306_v30 = vld [vmem:[#allocation9 + $0x84] ss:$16 sps:$4 sm:$0xff]   ;;  %2188 = vmatpush3.msra.mxu1 %v317_v26  ;;  %v312_v36 = vld [vmem:[%s3169_s5 + $0x30] sm:$0xff] }
  0x6c   :  { %2149 = vmatpush3.msra.mxu0 %v177_v2  ;;  %2189 = vmatprep.subr.mxu1 %v316_v27  ;;  %v314_v32 = vld [vmem:[%s3169_s5 + $0x40] sm:$0xff]  ;;  %v2309_v34 = vld [vmem:[#allocation9 + $0x64] ss:$16 sps:$4 sm:$0xff]   ;;  %v308_v44 = vld [vmem:[%s3169_s5 + $0x10] sm:$0xff] }
  0x6d   :  { %2150 = vmatprep.subr.mxu0 %v176_v3  ;;  %2190 = vmatpush3.msra.mxu1 %v316_v27  ;;  %v2304_v33 = vld [vmem:[#allocation9 + $0x80] ss:$16 sps:$4 sm:$0xff]   ;;  %v313_v35 = vld [vmem:[%s3169_s5 + $0x38] sm:$0xff]  ;;  %v311_v39 = vld [vmem:[%s3169_s5 + $0x28] sm:$0xff] }
  0x6e   :  { %2151 = vmatpush3.msra.mxu0 %v176_v3  ;;  %2191 = vmatprep.subr.mxu1 %v315_v31  ;;  %v2307_v37 = vld [vmem:[#allocation9 + $0x60] ss:$16 sps:$4 sm:$0xff]   ;;  %v2312_v38 = vld [vmem:[#allocation9 + $0x44] ss:$16 sps:$4 sm:$0xff]   ;;  %v1932_v52 = vld [vmem:[%s3195_s9] ss:$0 sm:$0xff] }
  0x6f   :  { %2152 = vmatprep.subr.mxu0 %v175_v4  ;;  %2192 = vmatpush3.msra.mxu1 %v315_v31  ;;  %v310_v40 = vld [vmem:[%s3169_s5 + $0x20] sm:$0xff]  ;;  %v2315_v42 = vld [vmem:[#allocation9 + $0x24] ss:$16 sps:$4 sm:$0xff]   ;;  %v2325_v22 = vld [vmem:[#allocation9 + $0xa8] ss:$16 sps:$4 sm:$0xff]  }
  0x70   :  { %2153 = vmatpush3.msra.mxu0 %v175_v4  ;;  %2193 = vmatprep.subr.mxu1 %v314_v32  ;;  %v2310_v41 = vld [vmem:[#allocation9 + $0x40] ss:$16 sps:$4 sm:$0xff]   ;;  %v309_v43 = vld [vmem:[%s3169_s5 + $0x18] sm:$0xff]  ;;  %v307_v47 = vld [vmem:[%s3169_s5 + $0x8] sm:$0xff] }
  0x71   :  { %2154 = vmatprep.subr.mxu0 %v174_v6  ;;  %2194 = vmatpush3.msra.mxu1 %v314_v32  ;;  %v2313_v45 = vld [vmem:[#allocation9 + $0x20] ss:$16 sps:$4 sm:$0xff]   ;;  %v2318_v46 = vld [vmem:[#allocation9 + $0x4] ss:$16 sps:$4 sm:$0xff]   ;;  %v2333_v26 = vld [vmem:[#allocation9 + $0x6c] ss:$16 sps:$4 sm:$0xff]  }
  0x72   :  { %2155 = vmatpush3.msra.mxu0 %v174_v6  ;;  %2195 = vmatprep.subr.mxu1 %v313_v35  ;;  %v306_v48 = vld [vmem:[%s3169_s5] sm:$0xff]  ;;  %v2331_v27 = vld [vmem:[#allocation9 + $0x68] ss:$16 sps:$4 sm:$0xff]  }
  0x73   :  { %2156 = vmatprep.subr.mxu0 %v173_v7  ;;  %2196 = vmatpush3.msra.mxu1 %v313_v35  ;;  %v2316_v49 = vld [vmem:[#allocation9] ss:$16 sps:$4 sm:$0xff]   ;;  %v2337_v31 = vld [vmem:[#allocation9 + $0x28] ss:$16 sps:$4 sm:$0xff]   ;;  %v2342_v32 = vld [vmem:[#allocation9 + $0xc] ss:$16 sps:$4 sm:$0xff]  }
  0x74   :  { %2157 = vmatpush3.msra.mxu0 %v173_v7  ;;  %2197 = vmatprep.subr.mxu1 %v312_v36  ;;  %v1935_v35 = vld [vmem:[%s3170_s6] ss:$0 sm:$0xff] }
  0x75   :  { %2158 = vmatprep.subr.mxu0 %v172_v8  ;;  %2198 = vmatpush3.msra.mxu1 %v312_v36 }
  0x76   :  { %2159 = vmatpush3.msra.mxu0 %v172_v8  ;;  %2199 = vmatprep.subr.mxu1 %v311_v39 }
  0x77   :  { %2160 = vmatprep.subr.mxu0 %v171_v9  ;;  %2200 = vmatpush3.msra.mxu1 %v311_v39 }
  0x78   :  { %2161 = vmatpush3.msra.mxu0 %v171_v9  ;;  %2201 = vmatprep.subr.mxu1 %v310_v40 }
  0x79   :  { %2162 = vmatprep.subr.mxu0 %v170_v10  ;;  %2202 = vmatpush3.msra.mxu1 %v310_v40 }
  0x7a   :  { %2163 = vmatpush3.msra.mxu0 %v170_v10  ;;  %2203 = vmatprep.subr.mxu1 %v309_v43  ;;  %v1933_v10 = vld [vmem:[#allocation6] ss:$0 sm:$0xff] }
  0x7b   :  { %2164 = vmatprep.subr.mxu0 %v169_v11  ;;  %2204 = vmatpush3.msra.mxu1 %v309_v43 }
  0x7c   :  { %2165 = vmatpush3.msra.mxu0 %v169_v11  ;;  %2205 = vmatprep.subr.mxu1 %v308_v44 }
  0x7d   :  { %2166 = vmatprep.subr.mxu0 %v168_v12  ;;  %2206 = vmatpush3.msra.mxu1 %v308_v44 }
  0x7e   :  { %2167 = vmatpush3.msra.mxu0 %v168_v12  ;;  %2207 = vmatprep.subr.mxu1 %v307_v47 }
  0x7f   :  { %2168 = vmatprep.subr.mxu0 %v167_v13  ;;  %2208 = vmatpush3.msra.mxu1 %v307_v47 }
  0x80   :  { %2169 = vmatpush3.msra.mxu0 %v167_v13  ;;  %2209 = vmatprep.subr.mxu1 %v306_v48  ;;  %v2319_v13 = vld [vmem:[#allocation9 + $0xe8] ss:$16 sps:$4 sm:$0xff]  }
  0x81   :  { %2170 = vmatprep.subr.mxu0 %v166_v14  ;;  %2210 = vmatpush3.msra.mxu1 %v306_v48 }
  0x82   :  { %2171 = vmatpush3.msra.mxu0 %v166_v14  ;;  %975 = vmatprep.subr.bf16.mxu1 %v2321_v50 }
  0x83   :  { %2172 = vmatprep.subr.mxu0 %v165_v15 }
  0x84   :  { %2173 = vmatpush3.msra.mxu0 %v165_v15  ;;  %v1934_v15 = vld [vmem:[#allocation8] ss:$0 sm:$0xff] }
  0x85   :  { %2174 = vmatprep.subr.mxu0 %v164_v16 }
  0x86   :  { %2175 = vmatpush3.msra.mxu0 %v164_v16  ;;  %v2324_v16 = vld [vmem:[#allocation9 + $0xcc] ss:$16 sps:$4 sm:$0xff]  }
  0x87   :  { %2177 = vmatmul.mubr.f32.vlgmr.msra.gmra.mxu0 %v163_v17  ;;  %922 = vmatprep.subr.bf16.mxu0 %v2297_v19  ;;  %v2322_v19 = vld [vmem:[#allocation9 + $0xc8] ss:$16 sps:$4 sm:$0xff]  }
  0x88   :  { %923 = vmatpush1.bf16.msra.mxu0 %v2295_v21  ;;  %954 = vmatprep.mubr.bf16.mxu0 %v2648_v51  ;;  %v2327_v21 = vld [vmem:[#allocation9 + $0xac] ss:$16 sps:$4 sm:$0xff]  }
  0x89   :  { %924 = vmatprep.subr.bf16.mxu0 %v2300_v23  ;;  %v2330_v23 = vld [vmem:[#allocation9 + $0x8c] ss:$16 sps:$4 sm:$0xff]  }
  0x8c   :  { %925 = vmatpush1.bf16.msra.mxu0 %v2298_v25  ;;  %v2328_v25 = vld [vmem:[#allocation9 + $0x88] ss:$16 sps:$4 sm:$0xff]  }
  0x8d   :  { %926 = vmatprep.subr.bf16.mxu0 %v2303_v29  ;;  %v2334_v29 = vld [vmem:[#allocation9 + $0x48] ss:$16 sps:$4 sm:$0xff]  }
  0x90   :  { %927 = vmatpush1.bf16.msra.mxu0 %v2301_v28  ;;  %v2336_v28 = vld [vmem:[#allocation9 + $0x4c] ss:$16 sps:$4 sm:$0xff]  }
  0x91   :  { %928 = vmatprep.subr.bf16.mxu0 %v2306_v30  ;;  %v2339_v30 = vld [vmem:[#allocation9 + $0x2c] ss:$16 sps:$4 sm:$0xff]  }
  0x94   :  { %929 = vmatpush1.bf16.msra.mxu0 %v2304_v33  ;;  %v2340_v33 = vld [vmem:[#allocation9 + $0x8] ss:$16 sps:$4 sm:$0xff]  }
  0x95   :  { %930 = vmatprep.subr.bf16.mxu0 %v2309_v34 }
  0x98   :  { %931 = vmatpush1.bf16.msra.mxu0 %v2307_v37 }
  0x99   :  { %932 = vmatprep.subr.bf16.mxu0 %v2312_v38 }
  0x9c   :  { %933 = vmatpush1.bf16.msra.mxu0 %v2310_v41 }
  0x9d   :  { %934 = vmatprep.subr.bf16.mxu0 %v2315_v42 }
  0xa0   :  { %935 = vmatpush1.bf16.msra.mxu0 %v2313_v45 }
  0xa1   :  { %936 = vmatprep.subr.bf16.mxu0 %v2318_v46 }
  0xa4   :  { %937 = vmatpush1.bf16.msra.mxu0 %v2316_v49 }
 0x147   :  { %v2178_v53 = vpop.f32.mrf.mxu0 }
 0x148   :  { %v259_v54 = vadd.f32 %v2178_v53, %v1932_v52 }
 0x149   :  { %v253_v55 = vpop.f32.mrf.mxu0 }
 0x14a   :  { %v265_v56 = vmul.f32 0.044715, %v259_v54  ;;  %v254_v57 = vadd.f32 %v1932_v52, %v253_v55  ;;  %v263_v4 = vmul.f32 0.5, %v259_v54 }
 0x14c   :  { %v267_v58 = vmul.f32 %v265_v56, %v259_v54  ;;  %v264_v59 = vmul.f32 0.044715, %v254_v57  ;;  %v262_v7 = vmul.f32 0.5, %v254_v57 }
 0x14e   :  { %v269_v60 = vmul.f32 %v267_v58, %v259_v54  ;;  %v266_v61 = vmul.f32 %v264_v59, %v254_v57 }
 0x150   :  { %v268_v62 = vmul.f32 %v266_v61, %v254_v57  ;;  %v271_v63 = vadd.f32 %v269_v60, %v259_v54 }
 0x152   :  { %v270_v0 = vadd.f32 %v268_v62, %v254_v57  ;;  %v273_v1 = vmul.f32 0.7978846, %v271_v63 }
 0x154   :  { %v272_v2 = vmul.f32 0.7978846, %v270_v0  ;;  %2391 = vtanh.f32 %v273_v1 }
 0x156   :  { %2393 = vtanh.f32 %v272_v2 }
 0x161   :  { %v2392_v3 = vpop.eup %2391 }
 0x162   :  { %v277_v5 = vadd.f32 1.0, %v2392_v3 }
 0x163   :  { %v2394_v6 = vpop.eup %2393 }
 0x164   :  { %v276_v8 = vadd.f32 1.0, %v2394_v6  ;;  %v279_v9 = vmul.f32 %v277_v5, %v263_v4 }
 0x166   :  { %v278_v11 = vmul.f32 %v276_v8, %v262_v7  ;;  %v2897_v14 = vadd.f32 %v1933_v10, %v279_v9  ;;  %v2906_v20 = vadd.f32 %v1934_v15, %v279_v9 }
 0x168   :  { %v2895_v12 = vadd.f32 %v1933_v10, %v278_v11  ;;  %v2900_v17 = vadd.f32 %v1934_v15, %v278_v11 }
 0x16a   :  { %2211 = vmatprep.mubr.f32.mxu1 %v2895_v12  ;;  %v739_v18 = vpack.c.bf16 %v2897_v14, %v2895_v12  ;;  %v740_v24 = vpack.c.bf16 %v2906_v20, %v2900_v17 }
 0x16b   :  { %2212 = vmatmul.mubr.f32.vlgmr.msra.gmra.mxu1 %v2897_v14 }
 0x16c   :  { %976 = vmatpush1.bf16.msra.mxu1 %v2319_v13  ;;  %2214 = vmatprep.mubr.f32.mxu1 %v2900_v17 }
 0x16d   :  { %955 = vmatmul.mubr.bf16.vlgmr.msra.gmra.mxu0 %v739_v18  ;;  %977 = vmatprep.subr.bf16.mxu1 %v2324_v16 }
 0x16e   :  { %964 = vmatprep.mubr.bf16.mxu0 %v2648_v51 }
 0x16f   :  { %2215 = vmatmul.mubr.f32.gmra.mxu1 %v2906_v20 }
 0x170   :  { %978 = vmatpush1.bf16.msra.mxu1 %v2322_v19  ;;  %1007 = vmatprep.mubr.bf16.mxu1 %v2648_v51 }
 0x171   :  { %979 = vmatprep.subr.bf16.mxu1 %v2327_v21 }
 0x174   :  { %980 = vmatpush1.bf16.msra.mxu1 %v2325_v22 }
 0x175   :  { %965 = vmatmul.mubr.bf16.gmra.mxu0 %v740_v24  ;;  %981 = vmatprep.subr.bf16.mxu1 %v2330_v23 }
 0x178   :  { %982 = vmatpush1.bf16.msra.mxu1 %v2328_v25 }
 0x179   :  { %983 = vmatprep.subr.bf16.mxu1 %v2333_v26 }
 0x17c   :  { %984 = vmatpush1.bf16.msra.mxu1 %v2331_v27 }
 0x17d   :  { %985 = vmatprep.subr.bf16.mxu1 %v2336_v28 }
 0x180   :  { %986 = vmatpush1.bf16.msra.mxu1 %v2334_v29 }
 0x181   :  { %987 = vmatprep.subr.bf16.mxu1 %v2339_v30 }
 0x184   :  { %988 = vmatpush1.bf16.msra.mxu1 %v2337_v31 }
 0x185   :  { %989 = vmatprep.subr.bf16.mxu1 %v2342_v32 }
 0x188   :  { %990 = vmatpush1.bf16.msra.mxu1 %v2340_v33 }
 0x18b   :  { %1008 = vmatmul.mubr.bf16.vlgmr.msra.gmra.mxu1 %v739_v18 }
 0x18c   :  { %1017 = vmatprep.mubr.bf16.mxu1 %v2648_v51 }
 0x193   :  { %1018 = vmatmul.mubr.bf16.gmra.mxu1 %v740_v24  ;;  %v557_v24 = vlaneseq }
 0x195   :  { %v2942_v25 = vand.u32 127, %v557_v24 }
 0x22b   :  { %v2213_v34 = vpop.f32.mrf.mxu1 }
 0x22c   :  { %v499_v39 = vadd.f32 %v2213_v34, %v1935_v35 }
 0x22d   :  { %v493_v36 = vpop.f32.mrf.mxu1 }
 0x22e   :  { %v494_v37 = vadd.f32 %v1935_v35, %v493_v36  ;;  %v516_v45 = vsel %vm512_vm0, %v499_v39, -inf }
 0x22f   :  { %v2216_v38 = vpop.f32.mrf.mxu1 }
 0x230   :  { %v513_v40 = vsel %vm512_vm0, %v494_v37, -inf  ;;  %v509_v43 = vadd.f32 %v2216_v38, %v1935_v35 }
 0x231   :  { %v503_v41 = vpop.f32.mrf.mxu1  ;;  %514 = vmax.xlane.f32.xlu0 %v513_v40 }
 0x232   :  { %v504_v42 = vadd.f32 %v1935_v35, %v503_v41  ;;  %v522_v46 = vsel %vm512_vm0, %v509_v43, -inf }
 0x234   :  { %v519_v44 = vsel %vm512_vm0, %v504_v42, -inf }
 0x235   :  { %520 = vmax.xlane.f32.xlu1 %v519_v44  ;;  %517 = vmax.xlane.f32.xlu0 %v516_v45 }
 0x239   :  { %523 = vmax.xlane.f32.xlu1 %v522_v46 }
 0x2ba   :  { %v515_v47 = vpop.xlane.xlu0 %514 }
 0x2bb   :  { %v525_v48 = vsub.f32 %v494_v37, %v515_v47 }
 0x2bd   :  { %v529_v49 = vmul.f32 1.442695, %v525_v48 }
 0x2be   :  { %v521_v50 = vpop.xlane.xlu1 %520  ;;  %v518_v52 = vpop.xlane.xlu0 %517 }
 0x2bf   :  { %2395 = vpow2.f32 %v529_v49  ;;  %v527_v53 = vsub.f32 %v504_v42, %v521_v50  ;;  %v526_v54 = vsub.f32 %v499_v39, %v518_v52 }
 0x2c1   :  { %v533_v55 = vmul.f32 1.442695, %v527_v53  ;;  %v531_v56 = vmul.f32 1.442695, %v526_v54 }
 0x2c2   :  { %v524_v57 = vpop.xlane.xlu1 %523 }
 0x2c3   :  { %2397 = vpow2.f32 %v533_v55  ;;  %v528_v58 = vsub.f32 %v509_v43, %v524_v57 }
 0x2c4   :  { %2399 = vpow2.f32 %v531_v56 }
 0x2c5   :  { %v535_v59 = vmul.f32 1.442695, %v528_v58 }
 0x2c7   :  { %2401 = vpow2.f32 %v535_v59 }
 0x2cc   :  { %v2396_v60 = vpop.eup %2395 }
 0x2cd   :  { %v537_v61 = vsel %vm512_vm0, %v2396_v60, 0.0 }
 0x2ce   :  { %538 = vadd.xlane.f32.xlu0 %v537_v61 }
 0x2d0   :  { %v2398_v62 = vpop.eup %2397 }
 0x2d1   :  { %v2400_v63 = vpop.eup %2399  ;;  %v543_v0 = vsel %vm512_vm0, %v2398_v62, 0.0 }
 0x2d2   :  { %544 = vadd.xlane.f32.xlu0 %v543_v0  ;;  %v540_v1 = vsel %vm512_vm0, %v2400_v63, 0.0 }
 0x2d3   :  { %541 = vadd.xlane.f32.xlu1 %v540_v1 }
 0x2d4   :  { %v2402_v2 = vpop.eup %2401 }
 0x2d5   :  { %v546_v3 = vsel %vm512_vm0, %v2402_v2, 0.0 }
 0x2d7   :  { %547 = vadd.xlane.f32.xlu1 %v546_v3 }
 0x357   :  { %v539_v4 = vpop.xlane.xlu0 %538 }
 0x358   :  { %2403 = vrcp.f32 %v539_v4 }
 0x35b   :  { %v545_v5 = vpop.xlane.xlu0 %544 }
 0x35c   :  { %v542_v6 = vpop.xlane.xlu1 %541  ;;  %2405 = vrcp.f32 %v545_v5 }
 0x35d   :  { %2407 = vrcp.f32 %v542_v6 }
 0x360   :  { %v548_v7 = vpop.xlane.xlu1 %547 }
 0x361   :  { %2409 = vrcp.f32 %v548_v7 }
 0x365   :  { %v2404_v8 = vpop.eup %2403 }
 0x366   :  { %v2925_v9 = vmul.f32 %v2404_v8, %v2396_v60 }
 0x368   :  { %v559_v10 = vsel %vm512_vm0, %v2925_v9, -inf }
 0x369   :  { %v2406_v11 = vpop.eup %2405  ;;  %560 = vmax.xlane.f32.xlu0 %v559_v10 }
 0x36a   :  { %v2408_v13 = vpop.eup %2407  ;;  %v2929_v15 = vmul.f32 %v2406_v11, %v2398_v62 }
 0x36b   :  { %v2931_v16 = vmul.f32 %v2408_v13, %v2400_v63 }
 0x36c   :  { %v565_v18 = vsel %vm512_vm0, %v2929_v15, -inf }
 0x36d   :  { %v562_v19 = vsel %vm512_vm0, %v2931_v16, -inf  ;;  %566 = vmax.xlane.f32.xlu0 %v565_v18 }
 0x36e   :  { %v2410_v21 = vpop.eup %2409  ;;  %563 = vmax.xlane.f32.xlu1 %v562_v19 }
 0x36f   :  { %v2937_v22 = vmul.f32 %v2410_v21, %v2402_v2 }
 0x371   :  { %v568_v23 = vsel %vm512_vm0, %v2937_v22, -inf }
 0x372   :  { %569 = vmax.xlane.f32.xlu1 %v568_v23 }
 0x3f2   :  { %v561_v26 = vpop.xlane.xlu0 %560 }
 0x3f3   :  { %vm571_vm1 = vcmp.eq.f32.partialorder %v2925_v9, %v561_v26 }
 0x3f4   :  { %v575_v27 = vsel %vm571_vm1, %v2942_v25, 4 }
 0x3f5   :  { %v579_v28 = vsel %vm512_vm0, %v575_v27, 2147483647 }
 0x3f6   :  { %v567_v29 = vpop.xlane.xlu0 %566  ;;  %v581_v30 = vshra.s32 %v579_v28, 16  ;;  %v580_v46 = vand.u32 65535, %v579_v28 }
 0x3f7   :  { %v564_v31 = vpop.xlane.xlu1 %563  ;;  %vm573_vm2 = vcmp.eq.f32.partialorder %v2929_v15, %v567_v29 }
 0x3f8   :  { %vm572_vm3 = vcmp.eq.f32.partialorder %v2931_v16, %v564_v31  ;;  %v577_v32 = vsel %vm573_vm2, %v2942_v25, 4  ;;  %v583_v33 = vcvt.s32.f32 %v581_v30  ;;  %v582_v48 = vcvt.s32.f32 %v580_v46 }
 0x3f9   :  { %v576_v34 = vsel %vm572_vm3, %v2942_v25, 4  ;;  %v609_v35 = vsel %vm512_vm0, %v577_v32, 2147483647 }
 0x3fa   :  { %v594_v36 = vsel %vm512_vm0, %v576_v34, 2147483647  ;;  %584 = vmin.xlane.f32.xlu0 %v583_v33  ;;  %v611_v37 = vshra.s32 %v609_v35, 16  ;;  %v610_v49 = vand.u32 65535, %v609_v35 }
 0x3fb   :  { %v570_v38 = vpop.xlane.xlu1 %569  ;;  %v596_v39 = vshra.s32 %v594_v36, 16  ;;  %v595_v50 = vand.u32 65535, %v594_v36 }
 0x3fc   :  { %vm574_vm4 = vcmp.eq.f32.partialorder %v2937_v22, %v570_v38  ;;  %v613_v40 = vcvt.s32.f32 %v611_v37  ;;  %v612_v54 = vcvt.s32.f32 %v610_v49 }
 0x3fd   :  { %v578_v41 = vsel %vm574_vm4, %v2942_v25, 4  ;;  %v598_v42 = vcvt.s32.f32 %v596_v39  ;;  %v597_v56 = vcvt.s32.f32 %v595_v50 }
 0x3fe   :  { %v624_v43 = vsel %vm512_vm0, %v578_v41, 2147483647  ;;  %614 = vmin.xlane.f32.xlu0 %v613_v40 }
 0x3ff   :  { %599 = vmin.xlane.f32.xlu1 %v598_v42  ;;  %v626_v44 = vshra.s32 %v624_v43, 16  ;;  %v625_v57 = vand.u32 65535, %v624_v43 }
 0x401   :  { %v628_v45 = vcvt.s32.f32 %v626_v44  ;;  %v627_v61 = vcvt.s32.f32 %v625_v57 }
 0x403   :  { %629 = vmin.xlane.f32.xlu1 %v628_v45 }
 0x483   :  { %v585_v47 = vpop.xlane.xlu0 %584 }
 0x484   :  { %vm586_vm5 = vcmp.eq.f32.partialorder %v583_v33, %v585_v47  ;;  %v591_v63 = vcvt.f32.s32 %v585_v47 }
 0x485   :  { %v587_v52 = vsel %vm586_vm5, %v582_v48, inf }
 0x486   :  { %588 = vmin.xlane.f32.xlu0 %v587_v52  ;;  %v592_v1 = vshll.u32 %v591_v63, 16 }
 0x487   :  { %v615_v53 = vpop.xlane.xlu0 %614 }
 0x488   :  { %v600_v55 = vpop.xlane.xlu1 %599  ;;  %vm616_vm6 = vcmp.eq.f32.partialorder %v613_v40, %v615_v53  ;;  %v621_v2 = vcvt.f32.s32 %v615_v53 }
 0x489   :  { %vm601_vm7 = vcmp.eq.f32.partialorder %v598_v42, %v600_v55  ;;  %v617_v58 = vsel %vm616_vm6, %v612_v54, inf  ;;  %v606_v4 = vcvt.f32.s32 %v600_v55  ;;  %vm1164_vm6 = vcmask 1043456  }
 0x48a   :  { %v602_v59 = vsel %vm601_vm7, %v597_v56, inf  ;;  %618 = vmin.xlane.f32.xlu0 %v617_v58  ;;  %v622_v7 = vshll.u32 %v621_v2, 16 }
 0x48b   :  { %603 = vmin.xlane.f32.xlu1 %v602_v59  ;;  %v607_v11 = vshll.u32 %v606_v4, 16 }
 0x48c   :  { %v630_v60 = vpop.xlane.xlu1 %629 }
 0x48d   :  { %vm631_vm8 = vcmp.eq.f32.partialorder %v628_v45, %v630_v60  ;;  %v636_v13 = vcvt.f32.s32 %v630_v60 }
 0x48e   :  { %v632_v62 = vsel %vm631_vm8, %v627_v61, inf }
 0x48f   :  { %633 = vmin.xlane.f32.xlu1 %v632_v62  ;;  %v637_v28 = vshll.u32 %v636_v13, 16  ;;  %v420_v13 = vld [vmem:[%s3174_s10] sm:$0xf] }
 0x490   :  { %2217 = vmatprep.subr.msk.mxu0 %vm1164_vm6, %v420_v13 }
 0x491   :  { %2218 = vmatpush3.msk.msra.mxu0 %vm1164_vm6, %v420_v13  ;;  %v2361_v13 = vld [vmem:[#allocation11 + $0xe0] sm:$0xff]  }
 0x50f   :  { %v589_v0 = vpop.xlane.xlu0 %588 }
 0x510   :  { %v590_v3 = vcvt.f32.s32 %v589_v0 }
 0x512   :  { %v2956_v5 = vadd.s32 %v592_v1, %v590_v3 }
 0x513   :  { %v619_v6 = vpop.xlane.xlu0 %618 }
 0x514   :  { %v604_v8 = vpop.xlane.xlu1 %603  ;;  %v620_v10 = vcvt.f32.s32 %v619_v6  ;;  %vm639_vm9 = vcmp.eq.s32.totalorder %v2942_v25, %v2956_v5 }
 0x515   :  { %v605_v18 = vcvt.f32.s32 %v604_v8  ;;  %v647_v19 = vsel %vm639_vm9, -1e+30, %v2925_v9 }
 0x516   :  { %v2964_v21 = vadd.s32 %v622_v7, %v620_v10  ;;  %v651_v23 = vsel %vm512_vm0, %v647_v19, -inf }
 0x517   :  { %v2967_v26 = vadd.s32 %v607_v11, %v605_v18  ;;  %652 = vmax.xlane.f32.xlu0 %v651_v23  ;;  %v2649_v18 = vmov 1   ;;  %v2344_v23 = vld [vmem:[#allocation11 + $0x38] sm:$0xff]  }
 0x518   :  { %v634_v27 = vpop.xlane.xlu1 %633  ;;  %vm641_vm10 = vcmp.eq.s32.totalorder %v2942_v25, %v2964_v21  ;;  %2286 = vset.pattern.permute.xlu0 %v2649_v18  ;;  %v2354_v21 = vld [vmem:[#allocation11 + $0xb0] sm:$0xff]  }
 0x519   :  { %v635_v29 = vcvt.f32.s32 %v634_v27  ;;  %vm640_vm11 = vcmp.eq.s32.totalorder %v2942_v25, %v2967_v26  ;;  %v649_v30 = vsel %vm641_vm10, -1e+30, %v2929_v15  ;;  %v2345_v27 = vld [vmem:[#allocation11 + $0x70] sm:$0xff]  }
 0x51a   :  { %v648_v31 = vsel %vm640_vm11, -1e+30, %v2931_v16  ;;  %v657_v32 = vsel %vm512_vm0, %v649_v30, -inf  ;;  %v644_v5 = vsel %vm640_vm11, %v2931_v16, 0.0  ;;  %v2353_v26 = vld [vmem:[#allocation11 + $0xf0] sm:$0xff]  }
 0x51b   :  { %v2982_v33 = vadd.s32 %v637_v28, %v635_v29  ;;  %v654_v34 = vsel %vm512_vm0, %v648_v31, -inf  ;;  %658 = vmax.xlane.f32.xlu0 %v657_v32  ;;  %v2349_v28 = vld [vmem:[#allocation11 + $0xf8] sm:$0xff]   ;;  %v2346_v29 = vld [vmem:[#allocation11 + $0x30] sm:$0xff]   ;;  %v2351_v32 = vld [vmem:[#allocation11 + $0x60] sm:$0xff]  }
 0x51c   :  { %655 = vmax.xlane.f32.xlu1 %v654_v34  ;;  %2098 = vmatprep.subr.bf16.mxu0 %v2349_v28  ;;  %v2352_v34 = vld [vmem:[#allocation11 + $0x20] sm:$0xff]   ;;  %v2371_v28 = vld [vmem:[#allocation11 + $0xc8] sm:$0xff]  }
 0x51d   :  { %vm642_vm12 = vcmp.eq.s32.totalorder %v2942_v25, %v2982_v33  ;;  %v2362_v33 = vld [vmem:[#allocation11 + $0xa0] sm:$0xff]  }
 0x51e   :  { %v650_v35 = vsel %vm642_vm12, -1e+30, %v2937_v22 }
 0x51f   :  { %v660_v36 = vsel %vm512_vm0, %v650_v35, -inf }
 0x520   :  { %661 = vmax.xlane.f32.xlu1 %v660_v36  ;;  %v2356_v36 = vld [vmem:[#allocation11 + $0x18] sm:$0xff]  }
 0x5a0   :  { %v653_v37 = vpop.xlane.xlu0 %652 }
 0x5a1   :  { %vm663_vm13 = vcmp.eq.f32.partialorder %v647_v19, %v653_v37  ;;  %v2343_v19 = vld [vmem:[#allocation11 + $0x78] sm:$0xff]   ;;  %v2359_v37 = vld [vmem:[#allocation11 + $0x50] sm:$0xff]  }
 0x5a2   :  { %v667_v38 = vsel %vm663_vm13, %v2942_v25, 4  ;;  %2070 = vmatprep.subr.bf16.mxu1 %v2343_v19  ;;  %v2651_v19 = vmov 2  }
 0x5a3   :  { %v671_v39 = vsel %vm512_vm0, %v667_v38, 2147483647  ;;  %2071 = vmatpush3.bf16.msra.mxu1 %v2344_v23  ;;  %v2360_v38 = vld [vmem:[#allocation11 + $0x10] sm:$0xff]  }
 0x5a4   :  { %v659_v40 = vpop.xlane.xlu0 %658  ;;  %v673_v41 = vshra.s32 %v671_v39, 16  ;;  %v672_v58 = vand.u32 65535, %v671_v39  ;;  %2072 = vmatprep.subr.bf16.mxu1 %v2345_v27  ;;  %v2363_v39 = vld [vmem:[#allocation11 + $0x48] sm:$0xff]   ;;  %v2369_v23 = vld [vmem:[#allocation11 + $0xd0] sm:$0xff]  }
 0x5a5   :  { %v656_v42 = vpop.xlane.xlu1 %655  ;;  %vm665_vm14 = vcmp.eq.f32.partialorder %v649_v30, %v659_v40  ;;  %v2347_v30 = vld [vmem:[#allocation11 + $0x68] sm:$0xff]   ;;  %v2370_v27 = vld [vmem:[#allocation11 + $0x90] sm:$0xff]  }
 0x5a6   :  { %vm664_vm15 = vcmp.eq.f32.partialorder %v648_v31, %v656_v42  ;;  %v669_v43 = vsel %vm665_vm14, %v2942_v25, 4  ;;  %v675_v44 = vcvt.s32.f32 %v673_v41  ;;  %v674_v60 = vcvt.s32.f32 %v672_v58  ;;  %v2348_v31 = vld [vmem:[#allocation11 + $0x28] sm:$0xff]   ;;  %v2367_v41 = vld [vmem:[#allocation11 + $0x40] sm:$0xff]  }
 0x5a7   :  { %v668_v45 = vsel %vm664_vm15, %v2942_v25, 4  ;;  %v701_v46 = vsel %vm512_vm0, %v669_v43, 2147483647  ;;  %2073 = vmatpush3.bf16.msra.mxu1 %v2346_v29  ;;  %v2364_v40 = vld [vmem:[#allocation11 + $0x8] sm:$0xff]  }
 0x5a8   :  { %v686_v47 = vsel %vm512_vm0, %v668_v45, 2147483647  ;;  %676 = vmin.xlane.f32.xlu0 %v675_v44  ;;  %v703_v48 = vshra.s32 %v701_v46, 16  ;;  %v702_v61 = vand.u32 65535, %v701_v46  ;;  %2074 = vmatprep.subr.bf16.mxu1 %v2347_v30  ;;  %v2372_v29 = vld [vmem:[#allocation11 + $0x88] sm:$0xff]   ;;  %v2373_v30 = vld [vmem:[#allocation11 + $0xc0] sm:$0xff]  }
 0x5a9   :  { %v662_v49 = vpop.xlane.xlu1 %661  ;;  %v688_v50 = vshra.s32 %v686_v47, 16  ;;  %v687_v62 = vand.u32 65535, %v686_v47 }
 0x5aa   :  { %vm666_vm1 = vcmp.eq.f32.partialorder %v650_v35, %v662_v49  ;;  %v705_v52 = vcvt.s32.f32 %v703_v48  ;;  %v704_v1 = vcvt.s32.f32 %v702_v61  ;;  %v2355_v35 = vld [vmem:[#allocation11 + $0x58] sm:$0xff]   ;;  %v2368_v61 = vld [vmem:[#allocation11] sm:$0xff]  }
 0x5ab   :  { %v670_v53 = vsel %vm666_vm1, %v2942_v25, 4  ;;  %v690_v54 = vcvt.s32.f32 %v688_v50  ;;  %v689_v3 = vcvt.s32.f32 %v687_v62  ;;  %2075 = vmatpush3.bf16.msra.mxu1 %v2348_v31  ;;  %v643_v50 = vsel %vm639_vm9, %v2925_v9, 0.0  ;;  %v2374_v31 = vld [vmem:[#allocation11 + $0x80] sm:$0xff]  }
 0x5ac   :  { %v716_v55 = vsel %vm512_vm0, %v670_v53, 2147483647  ;;  %706 = vmin.xlane.f32.xlu0 %v705_v52  ;;  %2076 = vmatprep.subr.bf16.mxu1 %v2351_v32  ;;  %v645_v62 = vsel %vm641_vm10, %v2929_v15, 0.0 }
 0x5ad   :  { %691 = vmin.xlane.f32.xlu1 %v690_v54  ;;  %v718_v56 = vshra.s32 %v716_v55, 16  ;;  %v717_v4 = vand.u32 65535, %v716_v55 }
 0x5af   :  { %v720_v57 = vcvt.s32.f32 %v718_v56  ;;  %v719_v10 = vcvt.s32.f32 %v717_v4  ;;  %2077 = vmatpush3.bf16.msra.mxu1 %v2352_v34  ;;  %v743_v34 = vshrl.u32 %v557_v24, 7 }
 0x5b0   :  { %2078 = vmatprep.subr.bf16.mxu1 %v2355_v35  ;;  %v1009_v35 = vpop.f32.mrf.mxu1 }
 0x5b1   :  { %721 = vmin.xlane.f32.xlu1 %v720_v57 }
 0x5b3   :  { %2079 = vmatpush3.bf16.msra.mxu1 %v2356_v36 }
 0x5b4   :  { %2080 = vmatprep.subr.bf16.mxu1 %v2359_v37  ;;  %v355_v37 = vld [vmem:[%s3172_s8] sm:$0xf] }
 0x5b7   :  { %2081 = vmatpush3.bf16.msra.mxu1 %v2360_v38  ;;  %v748_v38 = vsub.s32 1, %v743_v34 }
 0x5b8   :  { %2082 = vmatprep.subr.bf16.mxu1 %v2363_v39  ;;  %v1011_v39 = vpop.f32.mrf.mxu1 }
 0x5bb   :  { %2083 = vmatpush3.bf16.msra.mxu1 %v2364_v40 }
 0x5bc   :  { %2084 = vmatprep.subr.bf16.mxu1 %v2367_v41 }
 0x5bf   :  { %2085 = vmatpush3.bf16.msra.mxu1 %v2368_v61 }
 0x631   :  { %v3000_v59 = vpop.xlane.xlu0 %676 }
 0x632   :  { %vm678_vm2 = vcmp.eq.f32.partialorder %v675_v44, %v3000_v59  ;;  %v683_v42 = vcvt.f32.s32 %v3000_v59 }
 0x633   :  { %v679_v63 = vsel %vm678_vm2, %v674_v60, inf }
 0x634   :  { %680 = vmin.xlane.f32.xlu0 %v679_v63  ;;  %v684_v44 = vshll.u32 %v683_v42, 16  ;;  %v749_v42 = vrot.slane %v355_v37, %v748_v38 }
 0x635   :  { %v3003_v0 = vpop.xlane.xlu0 %706 }
 0x636   :  { %v3005_v2 = vpop.xlane.xlu1 %691  ;;  %vm708_vm3 = vcmp.eq.f32.partialorder %v705_v52, %v3003_v0  ;;  %v713_v45 = vcvt.f32.s32 %v3003_v0  ;;  %v2350_v0 = vld [vmem:[#allocation11 + $0xb8] sm:$0xff]  }
 0x637   :  { %vm693_vm4 = vcmp.eq.f32.partialorder %v690_v54, %v3005_v2  ;;  %v709_v6 = vsel %vm708_vm3, %v704_v1, inf  ;;  %v698_v47 = vcvt.f32.s32 %v3005_v2 }
 0x638   :  { %v694_v7 = vsel %vm693_vm4, %v689_v3, inf  ;;  %710 = vmin.xlane.f32.xlu0 %v709_v6  ;;  %v714_v52 = vshll.u32 %v713_v45, 16  ;;  %v756_v45 = vsub.s32 3, %v743_v34 }
 0x639   :  { %695 = vmin.xlane.f32.xlu1 %v694_v7  ;;  %v699_v55 = vshll.u32 %v698_v47, 16  ;;  %v646_v7 = vsel %vm642_vm12, %v2937_v22, 0.0 }
 0x63a   :  { %v3009_v8 = vpop.xlane.xlu1 %721 }
 0x63b   :  { %vm723_vm5 = vcmp.eq.f32.partialorder %v720_v57, %v3009_v8  ;;  %v728_v56 = vcvt.f32.s32 %v3009_v8 }
 0x63c   :  { %v724_v11 = vsel %vm723_vm5, %v719_v10, inf  ;;  %v2358_v10 = vld [vmem:[#allocation11 + $0xa8] sm:$0xff]  }
 0x63d   :  { %725 = vmin.xlane.f32.xlu1 %v724_v11  ;;  %v2650_v11 = vmov 3  }
 0x6bd   :  { %v681_v43 = vpop.xlane.xlu0 %680 }
 0x6be   :  { %v682_v46 = vcvt.f32.s32 %v681_v43  ;;  %v1013_v43 = vpop.f32.mrf.mxu1 }
 0x6c0   :  { %v685_v48 = vadd.s32 %v684_v44, %v682_v46  ;;  %v1015_v24 = vpop.f32.mrf.mxu1 }
 0x6c1   :  { %v711_v49 = vpop.xlane.xlu0 %710 }
 0x6c2   :  { %vm731_vm7 = vcmp.eq.s32.totalorder %v2942_v25, %v685_v48  ;;  %v696_v53 = vpop.xlane.xlu1 %695  ;;  %v712_v54 = vcvt.f32.s32 %v711_v49 }
 0x6c3   :  { %v697_v57 = vcvt.f32.s32 %v696_v53  ;;  %v735_v58 = vsel %vm731_vm7, %v2925_v9, %v643_v50  ;;  %v729_v9 = vshll.u32 %v728_v56, 16 }
 0x6c4   :  { %v715_v59 = vadd.s32 %v714_v52, %v712_v54  ;;  %2219 = vmatprep.mubr.msk.f32.mxu0 %vm512_vm0, %v735_v58  ;;  %v757_v52 = vrot.slane %v355_v37, %v756_v45 }
 0x6c5   :  { %v700_v60 = vadd.s32 %v699_v55, %v697_v57  ;;  %v752_v55 = vsub.s32 2, %v743_v34 }
 0x6c6   :  { %vm733_vm8 = vcmp.eq.s32.totalorder %v2942_v25, %v715_v59  ;;  %v726_v63 = vpop.xlane.xlu1 %725  ;;  %v1016_v56 = vadd.f32 %v1015_v24, %v757_v52 }
 0x6c7   :  { %vm732_vm9 = vcmp.eq.s32.totalorder %v2942_v25, %v700_v60  ;;  %v727_v1 = vcvt.f32.s32 %v726_v63  ;;  %v737_v2 = vsel %vm733_vm8, %v2929_v15, %v645_v62  ;;  %v2357_v15 = vld [vmem:[#allocation11 + $0xe8] sm:$0xff]   ;;  %v753_v61 = vrot.slane %v355_v37, %v752_v55  ;;  %v1019_v63 = vpop.f32.mrf.mxu1 }
 0x6c8   :  { %v736_v3 = vsel %vm732_vm9, %v2931_v16, %v644_v5 }
 0x6c9   :  { %v1108_v4 = vpack.c.bf16 %v736_v3, %v735_v58  ;;  %v730_v6 = vadd.s32 %v729_v9, %v727_v1  ;;  %2220 = vmatmul.mubr.msk.f32.vlgmr.msra.gmra.mxu0 %vm512_vm0, %v736_v3  ;;  %v1012_v58 = vadd.f32 %v1011_v39, %v757_v52  ;;  %v1014_v62 = vadd.f32 %v1013_v43, %v753_v61 }
 0x6ca   :  { %2222 = vmatprep.mubr.msk.f32.mxu0 %vm512_vm0, %v737_v2  ;;  %2099 = vmatpush3.bf16.msra.mxu0 %v2350_v0  ;;  %v1010_v1 = vadd.f32 %v1009_v35, %v753_v61 }
 0x6cb   :  { %vm734_vm10 = vcmp.eq.s32.totalorder %v2942_v25, %v730_v6  ;;  %1112 = vperm.xlu1 %2287, %v1108_v4   ;;  %1123 = vperm.xlu0 %2286, %v1108_v4   ;;  %v2365_v25 = vld [vmem:[#allocation11 + $0xd8] sm:$0xff]   ;;  %v3060_v5 = vpack.c.bf16 %v1016_v56, %v1012_v58 }
 0x6cc   :  { %v738_v16 = vsel %vm734_vm10, %v2937_v22, %v646_v7  ;;  %2100 = vmatprep.subr.bf16.mxu0 %v2353_v26  ;;  %v2366_v22 = vld [vmem:[#allocation11 + $0x98] sm:$0xff]   ;;  %v3065_v26 = vpack.c.bf16 %v1014_v62, %v1010_v1 }
 0x6cd   :  { %v1109_v8 = vpack.c.bf16 %v738_v16, %v737_v2  ;;  %2223 = vmatmul.mubr.msk.f32.gmra.mxu0 %vm512_vm0, %v738_v16  ;;  %v1047_v3 = vmul.bf16 1027030327, %v3060_v5  ;;  %vm2653_vm0 = vmmov 0  }
 0x6ce   :  { %2101 = vmatpush3.bf16.msra.mxu0 %v2354_v21 }
 0x6cf   :  { %2288 = vset.pattern.permute.xlu1 %v2650_v11  ;;  %2102 = vmatprep.subr.bf16.mxu0 %v2357_v15  ;;  %v1055_v16 = vmul.bf16 %v1047_v3, %v3060_v5 }
 0x6d0   :  { %1143 = vperm.xlu1 %2288, %v1108_v4   ;;  %2294 = vset.pattern.permute.xlu0 %v2650_v11 }
 0x6d2   :  { %2103 = vmatpush3.bf16.msra.mxu0 %v2358_v10 }
 0x6d3   :  { %2104 = vmatprep.subr.bf16.mxu0 %v2361_v13 }
 0x6d4   :  { %2289 = vset.pattern.permute.xlu1 %v2651_v19 }
 0x6d5   :  { %1133 = vperm.xlu1 %2289, %v1108_v4   ;;  %v1021_v4 = vpop.f32.mrf.mxu1 }
 0x6d6   :  { %2105 = vmatpush3.bf16.msra.mxu0 %v2362_v33  ;;  %v1022_v35 = vadd.f32 %v1021_v4, %v757_v52 }
 0x6d7   :  { %2106 = vmatprep.subr.bf16.mxu0 %v2365_v25  ;;  %v1023_v10 = vpop.f32.mrf.mxu1 }
 0x6d8   :  { %v1024_v39 = vadd.f32 %v1023_v10, %v753_v61 }
 0x6d9   :  { %2290 = vset.pattern.permute.xlu1 %v2649_v18  ;;  %v956_v18 = vpop.f32.mrf.mxu0 }
 0x6da   :  { %1127 = vperm.xlu1 %2290, %v1109_v8   ;;  %2107 = vmatpush3.bf16.msra.mxu0 %v2366_v22 }
 0x6db   :  { %2108 = vmatprep.subr.bf16.mxu0 %v2369_v23  ;;  %v958_v32 = vpop.f32.mrf.mxu0  ;;  %v1025_v23 = vpop.f32.mrf.mxu1 }
 0x6dc   :  { %v959_v49 = vadd.f32 %v958_v32, %v749_v42 }
 0x6dd   :  { %v960_v36 = vpop.f32.mrf.mxu0 }
 0x6de   :  { %2291 = vset.pattern.permute.xlu1 %v2648_v51  ;;  %2109 = vmatpush3.bf16.msra.mxu0 %v2370_v27  ;;  %v744_v51 = vsub.s32 0, %v743_v34 }
 0x6df   :  { %1117 = vperm.xlu1 %2291, %v1109_v8   ;;  %2110 = vmatprep.subr.bf16.mxu0 %v2371_v28  ;;  %v962_v40 = vpop.f32.mrf.mxu0 }
 0x6e0   :  { %v745_v41 = vrot.slane %v355_v37, %v744_v51  ;;  %v963_v46 = vadd.f32 %v962_v40, %v749_v42 }
 0x6e1   :  { %v966_v47 = vpop.f32.mrf.mxu0 }
 0x6e2   :  { %2111 = vmatpush3.bf16.msra.mxu0 %v2372_v29  ;;  %v961_v44 = vadd.f32 %v960_v36, %v745_v41  ;;  %v957_v48 = vadd.f32 %v956_v18, %v745_v41  ;;  %v3056_v53 = vpack.c.bf16 %v963_v46, %v959_v49  ;;  %v967_v22 = vadd.f32 %v966_v47, %v745_v41 }
 0x6e3   :  { %2292 = vset.pattern.permute.xlu1 %v2650_v11  ;;  %2112 = vmatprep.subr.bf16.mxu0 %v2373_v30  ;;  %v968_v54 = vpop.f32.mrf.mxu0  ;;  %v1026_v18 = vadd.f32 %v1025_v23, %v757_v52  ;;  %v1038_v23 = vmul.bf16 1056980736, %v3065_v26 }
 0x6e4   :  { %1147 = vperm.xlu1 %2292, %v1109_v8   ;;  %v3054_v50 = vpack.c.bf16 %v961_v44, %v957_v48  ;;  %v1045_v59 = vmul.bf16 1027030327, %v3056_v53  ;;  %v969_v15 = vadd.f32 %v968_v54, %v749_v42  ;;  %v1037_v1 = vmul.bf16 1056980736, %v3056_v53 }
 0x6e5   :  { %v970_v60 = vpop.f32.mrf.mxu0  ;;  %v3084_v37 = vpack.c.bf16 %v1026_v18, %v1022_v35 }
 0x6e6   :  { %2113 = vmatpush3.bf16.msra.mxu0 %v2374_v31  ;;  %v1044_v57 = vmul.bf16 1027030327, %v3054_v50  ;;  %v1053_v2 = vmul.bf16 %v1045_v59, %v3056_v53  ;;  %v971_v33 = vadd.f32 %v970_v60, %v745_v41 }
 0x6e7   :  { %v972_v9 = vpop.f32.mrf.mxu0  ;;  %v1051_v44 = vmul.bf16 1027030327, %v3084_v37 }
 0x6e8   :  { %2293 = vset.pattern.permute.xlu1 %v2651_v19  ;;  %v1052_v0 = vmul.bf16 %v1044_v57, %v3054_v50  ;;  %v973_v6 = vadd.f32 %v972_v9, %v749_v42  ;;  %v1061_v7 = vmul.bf16 %v1053_v2, %v3056_v53  ;;  %v1063_v19 = vmul.bf16 %v1055_v16, %v3060_v5 }
 0x6e9   :  { %1137 = vperm.xlu1 %2293, %v1109_v8   ;;  %v1046_v8 = vmul.bf16 1027030327, %v3065_v26  ;;  %v3078_v30 = vpack.c.bf16 %v971_v33, %v967_v22  ;;  %v1020_v42 = vadd.f32 %v1019_v63, %v753_v61  ;;  %v1059_v49 = vmul.bf16 %v1051_v44, %v3084_v37 }
 0x6ea   :  { %v1060_v21 = vmul.bf16 %v1052_v0, %v3054_v50  ;;  %v3071_v11 = vpack.c.bf16 %v973_v6, %v969_v15  ;;  %v1069_v25 = vadd.bf16 %v1061_v7, %v3056_v53  ;;  %v1071_v32 = vadd.bf16 %v1063_v19, %v3060_v5 }
 0x6eb   :  { %v1054_v27 = vmul.bf16 %v1046_v8, %v3065_v26  ;;  %v1048_v51 = vmul.bf16 1027030327, %v3078_v30  ;;  %v3090_v45 = vpack.c.bf16 %v1024_v39, %v1020_v42  ;;  %v1067_v56 = vmul.bf16 %v1059_v49, %v3084_v37 }
 0x6ec   :  { %v1068_v13 = vadd.bf16 %v1060_v21, %v3054_v50  ;;  %v1049_v28 = vmul.bf16 1027030327, %v3071_v11  ;;  %v1077_v31 = vmul.bf16 1061961548, %v1069_v25  ;;  %v1079_v38 = vmul.bf16 1061961548, %v1071_v32 }
 0x6ed   :  { %v1062_v34 = vmul.bf16 %v1054_v27, %v3065_v26  ;;  %v1056_v43 = vmul.bf16 %v1048_v51, %v3078_v30  ;;  %v1050_v24 = vmul.bf16 1027030327, %v3090_v45  ;;  %v1075_v62 = vadd.bf16 %v1067_v56, %v3084_v37 }
 0x6ee   :  { %v1076_v29 = vmul.bf16 1061961548, %v1068_v13  ;;  %v1057_v36 = vmul.bf16 %v1049_v28, %v3071_v11  ;;  %v1036_v9 = vmul.bf16 1056980736, %v3054_v50  ;;  %v1039_v13 = vmul.bf16 1056980736, %v3060_v5 }
 0x6ef   :  { %v1070_v40 = vadd.bf16 %v1062_v34, %v3065_v26  ;;  %v1064_v48 = vmul.bf16 %v1056_v43, %v3078_v30  ;;  %v1058_v58 = vmul.bf16 %v1050_v24, %v3090_v45  ;;  %v1083_v4 = vmul.bf16 1061961548, %v1075_v62 }
 0x6f0   :  { %2411 = vtanh.bf16 %v1076_v29  ;;  %v1065_v41 = vmul.bf16 %v1057_v36, %v3071_v11  ;;  %v1041_v5 = vmul.bf16 1056980736, %v3071_v11  ;;  %v1043_v43 = vmul.bf16 1056980736, %v3084_v37 }
 0x6f1   :  { %2413 = vtanh.bf16 %v1077_v31  ;;  %v1078_v46 = vmul.bf16 1061961548, %v1070_v40  ;;  %v1072_v54 = vadd.bf16 %v1064_v48, %v3078_v30  ;;  %v1066_v63 = vmul.bf16 %v1058_v58, %v3090_v45 }
 0x6f2   :  { %2415 = vtanh.bf16 %v1079_v38  ;;  %v1073_v47 = vadd.bf16 %v1065_v41, %v3071_v11  ;;  %v1040_v38 = vmul.bf16 1056980736, %v3078_v30  ;;  %v1042_v48 = vmul.bf16 1056980736, %v3090_v45 }
 0x6f3   :  { %2417 = vtanh.bf16 %v1078_v46  ;;  %v1080_v59 = vmul.bf16 1061961548, %v1072_v54  ;;  %v1074_v15 = vadd.bf16 %v1066_v63, %v3090_v45 }
 0x6f4   :  { %v1081_v52 = vmul.bf16 1061961548, %v1073_v47 }
 0x6f5   :  { %v1082_v33 = vmul.bf16 1061961548, %v1074_v15 }
 0x6f6   :  { %2419 = vtanh.bf16 %v1081_v52 }
 0x6f7   :  { %2421 = vtanh.bf16 %v1080_v59 }
 0x6f8   :  { %2423 = vtanh.bf16 %v1083_v4 }
 0x6f9   :  { %2425 = vtanh.bf16 %v1082_v33 }
 0x6fe   :  { %v2412_v55 = vpop.eup %2411 }
 0x6ff   :  { %v2414_v57 = vpop.eup %2413  ;;  %v1092_v60 = vadd.bf16 1065369472, %v2412_v55 }
 0x700   :  { %v1093_v61 = vadd.bf16 1065369472, %v2414_v57  ;;  %v2416_v0 = vpop.eup %2415 }
 0x701   :  { %v1100_v2 = vmul.bf16 %v1092_v60, %v1036_v9  ;;  %v1095_v7 = vadd.bf16 1065369472, %v2416_v0  ;;  %v2418_v10 = vpop.eup %2417 }
 0x702   :  { %v1101_v3 = vmul.bf16 %v1093_v61, %v1037_v1  ;;  %v1094_v25 = vadd.bf16 1065369472, %v2418_v10 }
 0x703   :  { %v1103_v50 = vmul.bf16 %v1095_v7, %v1039_v13 }
 0x704   :  { %v2420_v22 = vpop.eup %2419  ;;  %v1102_v27 = vmul.bf16 %v1094_v25, %v1038_v23 }
 0x705   :  { %v1097_v29 = vadd.bf16 1065369472, %v2420_v22  ;;  %v2422_v18 = vpop.eup %2421 }
 0x706   :  { %v1096_v35 = vadd.bf16 1065369472, %v2422_v18  ;;  %v2424_v51 = vpop.eup %2423 }
 0x707   :  { %v1105_v32 = vmul.bf16 %v1097_v29, %v1041_v5  ;;  %v1099_v40 = vadd.bf16 1065369472, %v2424_v51  ;;  %v2426_v42 = vpop.eup %2425 }
 0x708   :  { %v1104_v39 = vmul.bf16 %v1096_v35, %v1040_v38  ;;  %v1098_v11 = vadd.bf16 1065369472, %v2426_v42 }
 0x709   :  { %v1107_v44 = vmul.bf16 %v1099_v40, %v1043_v43 }
 0x70a   :  { %v1106_v49 = vmul.bf16 %v1098_v11, %v1042_v48  ;;  %v2376_v11 = vld [vmem:[#allocation12 + $0x30] sm:$0xff]   ;;  %v2378_v48 = vld [vmem:[#allocation12 + $0x20] sm:$0xff]  }
 0x746   :  { %v1113_v6 = vpop.permute.xlu1 %1112  ;;  %v1124_v21 = vpop.permute.xlu0 %1123 }
 0x747   :  { %v1120_v16 = vmul.bf16 %v1113_v6, %v1100_v2  ;;  %v1130_v8 = vmul.bf16 %v1124_v21, %v1101_v3 }
 0x749   :  { %1477 = vmatprep.mubr.bf16.mxu1 %v1130_v8 }
 0x74a   :  { %1478 = vmatmul.mubr.bf16.vlgmr.msra.gmra.mxu1 %v1120_v16 }
 0x74b   :  { %v1144_v53 = vpop.permute.xlu1 %1143 }
 0x74c   :  { %v1150_v19 = vmul.bf16 %v1144_v53, %v1103_v50 }
 0x74e   :  { %1526 = vmatprep.mubr.bf16.mxu0 %v1150_v19 }
 0x750   :  { %v1134_v28 = vpop.permute.xlu1 %1133 }
 0x751   :  { %v1140_v31 = vmul.bf16 %v1134_v28, %v1102_v27 }
 0x753   :  { %1527 = vmatmul.mubr.bf16.vlgmr.msra.gmra.mxu0 %v1140_v31 }
 0x755   :  { %v1128_v34 = vpop.permute.xlu1 %1127 }
 0x756   :  { %v1131_v36 = vmul.bf16 %v1128_v34, %v1105_v32 }
 0x758   :  { %1485 = vmatprep.mubr.bf16.mxu1 %v1131_v36 }
 0x75a   :  { %v1118_v26 = vpop.permute.xlu1 %1117 }
 0x75b   :  { %v1121_v41 = vmul.bf16 %v1118_v26, %v1104_v39 }
 0x75d   :  { %1486 = vmatmul.mubr.bf16.gmra.mxu1 %v1121_v41 }
 0x75f   :  { %v1148_v46 = vpop.permute.xlu1 %1147 }
 0x760   :  { %v1151_v47 = vmul.bf16 %v1148_v46, %v1107_v44  ;;  %v2375_v44 = vld [vmem:[#allocation12 + $0x38] sm:$0xff]   ;;  %v2652_v46 = vmov 0.0  }
 0x761   :  { %2225 = vmatprep.subr.bf16.mxu1 %v2652_v46  ;;  %2245 = vmatprep.subr.bf16.mxu0 %v2652_v46 }
 0x762   :  { %1534 = vmatprep.mubr.bf16.mxu0 %v1151_v47  ;;  %2226 = vmatpush3.bf16.msra.mxu1 %v2375_v44  ;;  %v2377_v47 = vld [vmem:[#allocation12 + $0x28] sm:$0xff]  }
 0x763   :  { %2227 = vmatprep.subr.bf16.mxu1 %v2652_v46  ;;  %2241 = vmatprep.mubr.msk.bf16.mxu1 %vm2653_vm0, %v2652_v46 }
 0x764   :  { %v1138_v24 = vpop.permute.xlu1 %1137 }
 0x765   :  { %v1141_v52 = vmul.bf16 %v1138_v24, %v1106_v49  ;;  %v2379_v49 = vld [vmem:[#allocation12 + $0x18] sm:$0xff]  }
 0x766   :  { %2228 = vmatpush3.bf16.msra.mxu1 %v2376_v11  ;;  %v2381_v24 = vld [vmem:[#allocation14 + $0x38] sm:$0xff]  }
 0x767   :  { %1535 = vmatmul.mubr.bf16.gmra.mxu0 %v1141_v52  ;;  %2229 = vmatprep.subr.bf16.mxu1 %v2652_v46  ;;  %v2380_v52 = vld [vmem:[#allocation12 + $0x10] sm:$0xff]  }
 0x768   :  { %2246 = vmatpush3.bf16.msra.mxu0 %v2381_v24  ;;  %2261 = vmatprep.mubr.msk.bf16.mxu0 %vm2653_vm0, %v2652_v46 }
 0x769   :  { %2247 = vmatprep.subr.bf16.mxu0 %v2652_v46 }
 0x76a   :  { %2230 = vmatpush3.bf16.msra.mxu1 %v2377_v47 }
 0x76b   :  { %2231 = vmatprep.subr.bf16.mxu1 %v2652_v46 }
 0x76e   :  { %2232 = vmatpush3.bf16.msra.mxu1 %v2378_v48 }
 0x76f   :  { %2233 = vmatprep.subr.bf16.mxu1 %v2652_v46 }
 0x772   :  { %2234 = vmatpush3.bf16.msra.mxu1 %v2379_v49 }
 0x773   :  { %2235 = vmatprep.subr.bf16.mxu1 %v2652_v46 }
 0x776   :  { %2236 = vmatpush3.bf16.msra.mxu1 %v2380_v52 }
 0x777   :  { %2237 = vmatprep.subr.bf16.mxu1 %v2652_v46 }
 0x789   :  { %v2221_v30 = vpop.f32.mrf.mxu0 }
 0x78b   :  { %v1234_v54 = vpop.f32.mrf.mxu0 }
 0x78d   :  { %v2224_v57 = vpop.f32.mrf.mxu0 }
 0x78f   :  { %v1244_v59 = vpop.f32.mrf.mxu0 }
 0x80a   :  { %v2086_v55 = vpop.f32.mrf.mxu1 }
 0x80c   :  { %v2087_v56 = vpop.f32.mrf.mxu1 }
 0x80d   :  { %v2088_v37 = vadd.f32 %v2087_v56, %v2086_v55  ;;  %v2385_v55 = vld [vmem:[#allocation14 + $0x28] sm:$0xff]   ;;  %v2384_v56 = vld [vmem:[#allocation12] sm:$0xff]  }
 0x80e   :  { %v2089_v58 = vpop.f32.mrf.mxu1 }
 0x80f   :  { %v1480_v63 = vadd.f32 %v2088_v37, %v1234_v54  ;;  %v2382_v54 = vld [vmem:[#allocation12 + $0x8] sm:$0xff]  }
 0x810   :  { %v2090_v60 = vpop.f32.mrf.mxu1  ;;  %2238 = vmatpush3.bf16.msra.mxu1 %v2382_v54  ;;  %v2389_v37 = vld [vmem:[#allocation14 + $0x8] sm:$0xff]  }
 0x811   :  { %v2091_v0 = vadd.f32 %v2090_v60, %v2089_v58  ;;  %2239 = vmatprep.subr.bf16.mxu1 %v2652_v46  ;;  %v2387_v58 = vld [vmem:[#allocation14 + $0x18] sm:$0xff]   ;;  %v2390_v60 = vld [vmem:[#allocation14] sm:$0xff]  }
 0x813   :  { %v2114_v61 = vpop.f32.mrf.mxu0  ;;  %v1483_v3 = vadd.f32 %v2221_v30, %v2091_v0  ;;  %v2383_v30 = vld [vmem:[#allocation14 + $0x30] sm:$0xff]  }
 0x814   :  { %2248 = vmatpush3.bf16.msra.mxu0 %v2383_v30  ;;  %2240 = vmatpush3.bf16.msra.mxu1 %v2384_v56 }
 0x815   :  { %v2115_v62 = vpop.f32.mrf.mxu0  ;;  %2249 = vmatprep.subr.bf16.mxu0 %v2652_v46 }
 0x816   :  { %v2116_v9 = vadd.f32 %v2115_v62, %v2114_v61 }
 0x817   :  { %v2117_v45 = vpop.f32.mrf.mxu0 }
 0x818   :  { %v1529_v1 = vadd.f32 %v2116_v9, %v1480_v63  ;;  %2250 = vmatpush3.bf16.msra.mxu0 %v2385_v55 }
 0x819   :  { %v2118_v2 = vpop.f32.mrf.mxu0  ;;  %2251 = vmatprep.subr.bf16.mxu0 %v2652_v46 }
 0x81a   :  { %v2119_v4 = vadd.f32 %v2118_v2, %v2117_v45  ;;  %1583 = vadd.xlane.f32.xlu1 %v1529_v1  ;;  %v2005_v2 = vld [vmem:[%s3175_s11] ss:$0 sm:$0xff] }
 0x81c   :  { %v1532_v6 = vadd.f32 %v2119_v4, %v1483_v3  ;;  %v2006_v4 = vld [vmem:[%s3176_s12] ss:$0 sm:$0xff] }
 0x81d   :  { %v2092_v21 = vpop.f32.mrf.mxu1 }
 0x81e   :  { %1585 = vadd.xlane.f32.xlu0 %v1532_v6 }
 0x81f   :  { %v2093_v7 = vpop.f32.mrf.mxu1 }
 0x820   :  { %v2094_v16 = vadd.f32 %v2093_v7, %v2092_v21 }
 0x821   :  { %v2095_v15 = vpop.f32.mrf.mxu1 }
 0x822   :  { %v1488_v50 = vadd.f32 %v2094_v16, %v1244_v59  ;;  %v2388_v59 = vld [vmem:[#allocation14 + $0x10] sm:$0xff]  }
 0x823   :  { %v2096_v8 = vpop.f32.mrf.mxu1 }
 0x824   :  { %v2097_v33 = vadd.f32 %v2096_v8, %v2095_v15 }
 0x826   :  { %v1491_v23 = vadd.f32 %v2224_v57, %v2097_v33  ;;  %v2386_v57 = vld [vmem:[#allocation14 + $0x20] sm:$0xff]  }
 0x827   :  { %v2120_v10 = vpop.f32.mrf.mxu0  ;;  %2252 = vmatpush3.bf16.msra.mxu0 %v2386_v57 }
 0x828   :  { %2253 = vmatprep.subr.bf16.mxu0 %v2652_v46 }
 0x829   :  { %v2121_v13 = vpop.f32.mrf.mxu0 }
 0x82a   :  { %v2122_v53 = vadd.f32 %v2121_v13, %v2120_v10 }
 0x82b   :  { %v2123_v25 = vpop.f32.mrf.mxu0  ;;  %2254 = vmatpush3.bf16.msra.mxu0 %v2387_v58 }
 0x82c   :  { %v1537_v19 = vadd.f32 %v2122_v53, %v1488_v50  ;;  %2255 = vmatprep.subr.bf16.mxu0 %v2652_v46 }
 0x82d   :  { %v2124_v22 = vpop.f32.mrf.mxu0 }
 0x82e   :  { %v2125_v27 = vadd.f32 %v2124_v22, %v2123_v25  ;;  %1587 = vadd.xlane.f32.xlu0 %v1537_v19 }
 0x82f   :  { %2256 = vmatpush3.bf16.msra.mxu0 %v2388_v59 }
 0x830   :  { %v1540_v28 = vadd.f32 %v2125_v27, %v1491_v23  ;;  %2257 = vmatprep.subr.bf16.mxu0 %v2652_v46 }
 0x832   :  { %1589 = vadd.xlane.f32.xlu1 %v1540_v28 }
 0x833   :  { %2258 = vmatpush3.bf16.msra.mxu0 %v2389_v37 }
 0x834   :  { %2259 = vmatprep.subr.bf16.mxu0 %v2652_v46 }
 0x837   :  { %2260 = vmatpush3.bf16.msra.mxu0 %v2390_v60 }
 0x8a3   :  { %v1584_v29 = vpop.xlane.xlu1 %1583 }
 0x8a4   :  { %v1592_v31 = vmul.f32 0.0078125, %v1584_v29 }
 0x8a6   :  { %v3110_v18 = vsub.f32 %v1529_v1, %v1592_v31 }
 0x8a7   :  { %v1586_v5 = vpop.xlane.xlu0 %1585 }
 0x8a8   :  { %v1593_v32 = vmul.f32 0.0078125, %v1586_v5  ;;  %v1600_v34 = vmul.f32 %v3110_v18, %v3110_v18 }
 0x8aa   :  { %v3114_v35 = vsub.f32 %v1532_v6, %v1593_v32  ;;  %1604 = vadd.xlane.f32.xlu0 %v1600_v34 }
 0x8ac   :  { %v1601_v36 = vmul.f32 %v3114_v35, %v3114_v35 }
 0x8ae   :  { %1606 = vadd.xlane.f32.xlu1 %v1601_v36 }
 0x8b7   :  { %v1588_v51 = vpop.xlane.xlu0 %1587 }
 0x8b8   :  { %v1594_v38 = vmul.f32 0.0078125, %v1588_v51  ;;  %v2008_v51 = vld [vmem:[%s3178_s14] ss:$0 sm:$0xff] }
 0x8ba   :  { %v3118_v39 = vsub.f32 %v1537_v19, %v1594_v38 }
 0x8bb   :  { %v1590_v26 = vpop.xlane.xlu1 %1589 }
 0x8bc   :  { %v1595_v40 = vmul.f32 0.0078125, %v1590_v26  ;;  %v1602_v41 = vmul.f32 %v3118_v39, %v3118_v39 }
 0x8be   :  { %v3122_v42 = vsub.f32 %v1540_v28, %v1595_v40  ;;  %1608 = vadd.xlane.f32.xlu0 %v1602_v41 }
 0x8c0   :  { %v1603_v43 = vmul.f32 %v3122_v42, %v3122_v42 }
 0x8c2   :  { %1610 = vadd.xlane.f32.xlu1 %v1603_v43 }
 0x933   :  { %v1605_v61 = vpop.xlane.xlu0 %1604 }
 0x934   :  { %v1612_v62 = vmul.f32 0.0078125, %v1605_v61 }
 0x936   :  { %v1616_v63 = vadd.f32 1e-05, %v1612_v62 }
 0x937   :  { %v1607_v0 = vpop.xlane.xlu1 %1606 }
 0x938   :  { %2427 = vrsqrt.f32 %v1616_v63  ;;  %v1613_v9 = vmul.f32 0.0078125, %v1607_v0 }
 0x93a   :  { %v1617_v45 = vadd.f32 1e-05, %v1613_v9 }
 0x93c   :  { %2429 = vrsqrt.f32 %v1617_v45 }
 0x945   :  { %v2428_v1 = vpop.eup %2427 }
 0x946   :  { %v1624_v3 = vmul.f32 %v2428_v1, %v3110_v18 }
 0x947   :  { %v1609_v6 = vpop.xlane.xlu0 %1608 }
 0x948   :  { %v1634_v21 = vmul.f32 %v2005_v2, %v1624_v3  ;;  %v1614_v7 = vmul.f32 0.0078125, %v1609_v6 }
 0x949   :  { %v2430_v15 = vpop.eup %2429 }
 0x94a   :  { %v1642_v16 = vadd.f32 %v2006_v4, %v1634_v21  ;;  %v1625_v8 = vmul.f32 %v2430_v15, %v3114_v35  ;;  %v1618_v10 = vadd.f32 1e-05, %v1614_v7  ;;  %v2007_v35 = vld [vmem:[%s3177_s13] ss:$0 sm:$0xff] }
 0x94b   :  { %v1611_v13 = vpop.xlane.xlu1 %1610 }
 0x94c   :  { %v1635_v50 = vmul.f32 %v2005_v2, %v1625_v8  ;;  %2431 = vrsqrt.f32 %v1618_v10  ;;  %v1615_v33 = vmul.f32 0.0078125, %v1611_v13  ;;  %v1646_v53 = vmul.f32 0.044715, %v1642_v16 }
 0x94d   :  { %v1644_v52 = vmul.f32 0.5, %v1642_v16 }
 0x94e   :  { %v1643_v25 = vadd.f32 %v2006_v4, %v1635_v50  ;;  %v1619_v19 = vadd.f32 1e-05, %v1615_v33  ;;  %v1648_v22 = vmul.f32 %v1646_v53, %v1642_v16 }
 0x950   :  { %2433 = vrsqrt.f32 %v1619_v19  ;;  %v1647_v23 = vmul.f32 0.044715, %v1643_v25  ;;  %v1650_v27 = vmul.f32 %v1648_v22, %v1642_v16  ;;  %v1645_v55 = vmul.f32 0.5, %v1643_v25 }
 0x952   :  { %v1649_v28 = vmul.f32 %v1647_v23, %v1643_v25  ;;  %v1652_v29 = vadd.f32 %v1650_v27, %v1642_v16 }
 0x954   :  { %v1651_v31 = vmul.f32 %v1649_v28, %v1643_v25  ;;  %v1654_v18 = vmul.f32 0.7978846, %v1652_v29 }
 0x956   :  { %v1653_v5 = vadd.f32 %v1651_v31, %v1643_v25  ;;  %2435 = vtanh.f32 %v1654_v18 }
 0x958   :  { %v1655_v32 = vmul.f32 0.7978846, %v1653_v5 }
 0x959   :  { %v2432_v34 = vpop.eup %2431 }
 0x95a   :  { %v1626_v36 = vmul.f32 %v2432_v34, %v3118_v39  ;;  %2437 = vtanh.f32 %v1655_v32 }
 0x95c   :  { %v1670_v38 = vmul.f32 %v2007_v35, %v1626_v36 }
 0x95d   :  { %v2434_v26 = vpop.eup %2433 }
 0x95e   :  { %v1678_v40 = vadd.f32 %v2008_v51, %v1670_v38  ;;  %v1627_v41 = vmul.f32 %v2434_v26, %v3122_v42 }
 0x960   :  { %v1671_v43 = vmul.f32 %v2007_v35, %v1627_v41  ;;  %v1682_v44 = vmul.f32 0.044715, %v1678_v40  ;;  %v1680_v45 = vmul.f32 0.5, %v1678_v40 }
 0x962   :  { %v1679_v46 = vadd.f32 %v2008_v51, %v1671_v43  ;;  %v1684_v11 = vmul.f32 %v1682_v44, %v1678_v40 }
 0x963   :  { %v2436_v47 = vpop.eup %2435 }
 0x964   :  { %v1683_v48 = vmul.f32 0.044715, %v1679_v46  ;;  %v1686_v49 = vmul.f32 %v1684_v11, %v1678_v40  ;;  %v1658_v24 = vadd.f32 1.0, %v2436_v47  ;;  %v1681_v2 = vmul.f32 0.5, %v1679_v46 }
 0x966   :  { %v1685_v39 = vmul.f32 %v1683_v48, %v1679_v46  ;;  %v1688_v30 = vadd.f32 %v1686_v49, %v1678_v40  ;;  %v1660_v57 = vmul.f32 %v1658_v24, %v1644_v52 }
 0x967   :  { %v2438_v54 = vpop.eup %2437 }
 0x968   :  { %v1659_v56 = vadd.f32 1.0, %v2438_v54  ;;  %v1687_v58 = vmul.f32 %v1685_v39, %v1679_v46  ;;  %v1690_v59 = vmul.f32 0.7978846, %v1688_v30  ;;  %v1662_v42 = vadd.f32 %v1660_v57, %v2895_v12  ;;  %v2009_v12 = vld [vmem:[%s3180_s16] ss:$0 sm:$0xff] }
 0x96a   :  { %v1661_v37 = vmul.f32 %v1659_v56, %v1645_v55  ;;  %v1689_v60 = vadd.f32 %v1687_v58, %v1679_v46  ;;  %2439 = vtanh.f32 %v1690_v59 }
 0x96c   :  { %v1663_v61 = vadd.f32 %v1661_v37, %v2897_v14  ;;  %v1691_v62 = vmul.f32 0.7978846, %v1689_v60 }
 0x96e   :  { %v1700_v63 = vpack.c.bf16 %v1663_v61, %v1662_v42  ;;  %2441 = vtanh.f32 %v1691_v62 }
 0x970   :  { %2242 = vmatmul.mubr.bf16.vlgmr.msra.gmra.mxu1 %v1700_v63 }
 0x977   :  { %v2440_v0 = vpop.eup %2439 }
 0x978   :  { %v1694_v9 = vadd.f32 1.0, %v2440_v0 }
 0x97a   :  { %v1696_v4 = vmul.f32 %v1694_v9, %v1680_v45 }
 0x97b   :  { %v2442_v1 = vpop.eup %2441 }
 0x97c   :  { %v1695_v3 = vadd.f32 1.0, %v2442_v1  ;;  %v1698_v21 = vadd.f32 %v1696_v4, %v2900_v17 }
 0x97e   :  { %v1697_v6 = vmul.f32 %v1695_v3, %v1681_v2 }
 0x980   :  { %v1699_v7 = vadd.f32 %v1697_v6, %v2906_v20 }
 0x982   :  { %v1796_v15 = vpack.c.bf16 %v1699_v7, %v1698_v21 }
 0x984   :  { %2262 = vmatmul.mubr.bf16.vlgmr.msra.gmra.mxu0 %v1796_v15 }
 0xa30   :  { %v1789_v14 = vpop.f32.mrf.mxu1 }
 0xa31   :  { %v1790_v16 = vadd.f32 %v2009_v12, %v1789_v14 }
 0xa32   :  { %v2243_v8 = vpop.f32.mrf.mxu1 }
 0xa33   :  { %1892 = vst [vmem:[#allocation15] sm:$0xff] %v1790_v16 }
 0xa34   :  { %v1792_v10 = vpop.f32.mrf.mxu1 }
 0xa35   :  { %v1793_v13 = vadd.f32 %v2009_v12, %v1792_v10 }
 0xa36   :  { %v2244_v50 = vpop.f32.mrf.mxu1 }
 0xa37   :  { %1893 = vst [vmem:[#allocation15 + $0x8] sm:$0xff] %v1793_v13 }
 0xa38   :  { %2594 = shalt.err (!%p2591_p11)
}
 0xa39   :  { %1907 = dma.vmem_to_hbm [thread:$0]  %s1902_s2, 256, %s3183_s19, [#allocation5], %s2643_s27, %s2643_s27, %s2644_s28  }
 0xa3a   :  { %v2018_v17 = vld [vmem:[%s3182_s18] ss:$0 sm:$0xff]  ;;  %s2655_s21 = smov [#allocation16]  }
 0xa3b   :  { %s1913_s1 = sshll.u32 %s2655_s21, 4  ;;  %s1914_s1 = int_to_ptr.vmem [resolvable:$true] %s1913_s1 }
 0xa3c   :  { %s2603_s9 = scalar_lea.vmem %s1914_s1, 256  ;;  %p2608_p13 = scmp.lt.s32.totalorder %s1914_s1, %s1914_s1 }
 0xa3d   :  { %p2604_p12 = scmp.ne.s32.totalorder %s1914_s1, %s2603_s9  ;;  %p2609_p0 = scmp.lt.s32.totalorder %s2603_s9, %s2603_s9 }
 0xa3f   :  { %p2610_p1 = por %p2609_p0, %p2608_p13 }
 0xa41   :  { %p2611_p2 = pnand %p2610_p1, %p2604_p12 }
 0xa44   :  { %v1885_v20 = vpop.f32.mrf.mxu0 }
 0xa45   :  { %v1886_v33 = vadd.f32 %v2018_v17, %v1885_v20 }
 0xa46   :  { %v2263_v53 = vpop.f32.mrf.mxu0 }
 0xa47   :  { %1894 = vst [vmem:[#allocation16] sm:$0xff] %v1886_v33 }
 0xa48   :  { %v1888_v25 = vpop.f32.mrf.mxu0 }
 0xa49   :  { %v1889_v19 = vadd.f32 %v2018_v17, %v1888_v25 }
 0xa4a   :  { %v2264_v22 = vpop.f32.mrf.mxu0 }
 0xa4b   :  { %1895 = vst [vmem:[#allocation16 + $0x8] sm:$0xff] %v1889_v19 }
 0xa4c   :  { %2614 = shalt.err (!%p2611_p2)
}
 0xa4d   :  { %1919 = dma.vmem_to_hbm [thread:$0]  %s1914_s1, 256, %s3184_s20, [#allocation17], %s2643_s27, %s2643_s27, %s2644_s28  }
 0xa4e   :  { %2631 = dma.done.wait [#allocation5], 256  }
 0xa4f   :  { %2632 = vsyncadd [#allocation5], 4294967040 }
 0xa50   :  { %2633 = dma.done.wait [#allocation17], 256  }
 0xa51   :  { %2634 = vsyncadd [#allocation17], 4294967040 }
 0xa52   :  { %1926 = vsyncpa [#allocation4], 1 }
 0xa53   :  { %1927 = vsyncpa [#allocation7], 1 }
 0xa54   :  { %1928 = vsyncpa [#allocation10], 1 }
 0xa55   :  { %1929 = vsyncpa [#allocation13], 1 }
 0xa56   :  { %1930 = vsyncpa [#allocation5], 1 }
 0xa57   :  { %1931 = vsyncpa [#allocation17], 1 }

</bundles_post_ra>
